<compile_context>
chip_gen: v5e
topology: v5e:2x2
jax: 0.10.0
libtpu: 0.0.40
codegen_flags: <defaults>
</compile_context>

<pallas_src>
import jax
import jax.numpy as jnp
from jax.experimental import pallas as pl
from jax.experimental.pallas import tpu as pltpu

# ----------------------------- hparams (small) -------------------------------
N_MEL = 8            # n_mel_channels
N_FRAMES = 2         # n_frames_per_step
ENC_DIM = 16         # encoder_output_dim
POS_DIM = 8          # positional_embedding_dim
PRENET_DIM = 32
RNN_DIM = 32         # decoder_rnn_dim

MEL_IN = N_MEL * N_FRAMES        # 16  (decoder mel frame dim)
DUR_DIM = ENC_DIM + POS_DIM      # 24  (duration_input dim)
GATE_DIM = 4 * RNN_DIM           # 128 (exactly one vreg lane width)


# ------------------------------ fused kernel ---------------------------------
def _make_kernel(T, BP):
    """Fused prenet + T-step LSTM decoder kernel (single invocation, no grid)."""

    def kernel(x_ref, dur_ref, pm1_ref, pm2_ref, dm1_ref, dm2_ref,
               w1p_ref, w2p_ref,
               w1xp_ref, w1xd_ref, w1h_ref, b1_ref,
               w2x_ref, w2h_ref, b2_ref,
               wph_ref, wpd_ref, bp_ref,
               out_ref, gx1_scr, h2_scr):
        f32, bf16, R = jnp.float32, jnp.bfloat16, RNN_DIM

        # ---- prenet for all T frames: two batched matmuls (dropout p=0.5) ----
        h = jnp.dot(x_ref[...].astype(bf16), w1p_ref[...],
                    preferred_element_type=f32)
        h = jnp.maximum(h, 0.0) * pm1_ref[...]
        h = jnp.dot(h.astype(bf16), w2p_ref[...], preferred_element_type=f32)
        h = jnp.maximum(h, 0.0) * pm2_ref[...]

        # ---- hoist ALL LSTM1 input-to-hidden gate work out of the loop -------
        dur_bf = dur_ref[...].astype(bf16)
        gx1 = (jnp.dot(h.astype(bf16), w1xp_ref[...], preferred_element_type=f32)
               + jnp.dot(dur_bf, w1xd_ref[...], preferred_element_type=f32)
               + b1_ref[...])
        gx1_scr[...] = gx1.reshape(T, BP, GATE_DIM)

        # ---- hoist the duration contribution of the projection ---------------
        proj_dur = jnp.dot(dur_bf, wpd_ref[...],
                           preferred_element_type=f32) + bp_ref[...]

        # ---- hoisted loop invariants -----------------------------------------
        lane = jax.lax.broadcasted_iota(jnp.int32, (BP, GATE_DIM), 1)
        g_sel = (lane >= 2 * R) & (lane < 3 * R)        # tanh ("g") lanes
        b2 = jnp.broadcast_to(b2_ref[...], (BP, GATE_DIM))
        w1h = w1h_ref[...]
        w2x = w2x_ref[...]
        w2h = w2h_ref[...]

        def activate(g):
            # single sigmoid over the full 128-lane gate vreg; tanh lanes are
            # recovered as 2*sigmoid(2x)-1 (the 2x is folded into the weights).
            s = jax.nn.sigmoid(g)
            a = jnp.where(g_sel, 2.0 * s - 1.0, s)
            return a[:, :R], a[:, R:2 * R], a[:, 2 * R:3 * R], a[:, 3 * R:]

        def step(t, carry):
            h1, c1, h2, c2 = carry

            # LSTMCell 1: input-to-hidden precomputed; only Whh1 on serial path
            g1 = gx1_scr[t] + jnp.dot(h1.astype(bf16), w1h,
                                      preferred_element_type=f32)
            i1, f1, gg1, o1 = activate(g1)
            c1 = f1 * c1 + i1 * gg1
            h1 = o1 * jnp.tanh(c1) * dm1_ref[t]

            # LSTMCell 2: two 32x128 matmuls (no lane concatenate)
            g2 = (jnp.dot(h1.astype(bf16), w2x, preferred_element_type=f32)
                  + jnp.dot(h2.astype(bf16), w2h, preferred_element_type=f32)
                  + b2)
            i2, f2, gg2, o2 = activate(g2)
            c2 = f2 * c2 + i2 * gg2
            h2 = o2 * jnp.tanh(c2) * dm2_ref[t]

            h2_scr[t] = h2
            return (h1, c1, h2, c2)

        z = jnp.zeros((BP, R), f32)
        jax.lax.fori_loop(0, T, step, (z, z, z, z), unroll=min(T, 4))

        # ---- one batched projection + one store after the loop ---------------
        mel = jnp.dot(h2_scr[...].reshape(T * BP, R).astype(bf16), wph_ref[...],
                      preferred_element_type=f32) + proj_dur
        out_ref[...] = mel.reshape(T, BP, MEL_IN)

    return kernel


# ------------------------------- parameters ----------------------------------
def init_params(key):
    ks = jax.random.split(key, 10)

    def xavier(k, shape):
        fan_in, fan_out = shape
        scale = jnp.sqrt(6.0 / (fan_in + fan_out))
        return jax.random.uniform(k, shape, jnp.float32, -scale, scale)

    return dict(
        pre_w1=xavier(ks[0], (MEL_IN, PRENET_DIM)),
        pre_w2=xavier(ks[1], (PRENET_DIM, PRENET_DIM)),
        # LSTM1 (gate column order i|f|g|o, as torch.nn.LSTMCell)
        wih1_p=xavier(ks[2], (PRENET_DIM, 4 * RNN_DIM)),
        wih1_d=xavier(ks[3], (DUR_DIM, 4 * RNN_DIM)),
        whh1=xavier(ks[4], (RNN_DIM, 4 * RNN_DIM)),
        b1=jnp.zeros((1, 4 * RNN_DIM), jnp.float32),   # = b_ih + b_hh (pre-summed)
        wih2=xavier(ks[5], (RNN_DIM, 4 * RNN_DIM)),
        whh2=xavier(ks[6], (RNN_DIM, 4 * RNN_DIM)),
        b2=jnp.zeros((1, 4 * RNN_DIM), jnp.float32),   # = b_ih + b_hh (pre-summed)
        # projection on cat(hidden2, duration), split into the two halves
        wproj_h=xavier(ks[7], (RNN_DIM, MEL_IN)),
        wproj_d=xavier(ks[8], (DUR_DIM, MEL_IN)),
        bproj=jnp.zeros((1, MEL_IN), jnp.float32),
    )


def _prepare_weights(params):
    """bf16-cast weights; fold a factor of 2 into the g-gate columns so the
    kernel needs only a single sigmoid pass (tanh(x) = 2*sigmoid(2x) - 1)."""
    bf16 = jnp.bfloat16
    sc = jnp.ones((1, GATE_DIM), jnp.float32)
    sc = sc.at[:, 2 * RNN_DIM:3 * RNN_DIM].set(2.0)
    return dict(
        pre_w1=params["pre_w1"].astype(bf16),
        pre_w2=params["pre_w2"].astype(bf16),
        w1xp=(params["wih1_p"] * sc).astype(bf16),
        w1xd=(params["wih1_d"] * sc).astype(bf16),
        w1h=(params["whh1"] * sc).astype(bf16),
        b1=params["b1"] * sc,
        w2x=(params["wih2"] * sc).astype(bf16),
        w2h=(params["whh2"] * sc).astype(bf16),
        b2=params["b2"] * sc,
        wp_h=params["wproj_h"].astype(bf16),
        wp_d=params["wproj_d"].astype(bf16),
        bp=params["bproj"],
    )


# ------------------------------- JAX wrapper ---------------------------------
def decoder_forward(duration_outputs, decoder_inputs, memory_lengths, params,
                    key, training=True):
    """Teacher-forced Decoder.forward."""
    # TODO(synk): get_mask_from_lengths is computed but never consumed in the
    # PyTorch forward, so memory_lengths is unused here.
    del memory_lengths
    B, T, _ = duration_outputs.shape
    BP = max(8, ((B + 7) // 8) * 8)          # pad batch to a full sublane

    # parse_decoder_inputs: (B, n_mel, T*nf) -> (T, B, n_mel*nf)
    di = jnp.transpose(decoder_inputs, (0, 2, 1)).reshape(B, T, MEL_IN)
    di = jnp.transpose(di, (1, 0, 2))
    # teacher forcing input at step t: go frame for t=0, else mel frame t-1
    x = jnp.concatenate([jnp.zeros((1, B, MEL_IN), jnp.float32), di[:T - 1]],
                        axis=0)
    dur = jnp.transpose(duration_outputs, (1, 0, 2)).astype(jnp.float32)

    # pad batch dimension to BP, flatten (T, BP) -> rows for batched matmuls
    x = jnp.pad(x, ((0, 0), (0, BP - B), (0, 0)))
    dur = jnp.pad(dur, ((0, 0), (0, BP - B), (0, 0)))
    x_flat = x.reshape(T * BP, MEL_IN)
    dur_flat = dur.reshape(T * BP, DUR_DIM)

    # Dropout masks (inverted-dropout scaling baked in), generated host-side:
    # the TPU hardware PRNG has no CPU/interpret lowering and the masks are tiny.
    k1, k2, k3, k4 = jax.random.split(key, 4)
    pm1 = jax.random.bernoulli(k1, 0.5, (T * BP, PRENET_DIM)).astype(jnp.float32) * 2.0
    pm2 = jax.random.bernoulli(k2, 0.5, (T * BP, PRENET_DIM)).astype(jnp.float32) * 2.0
    if training:
        dm1 = jax.random.bernoulli(k3, 0.9, (T, BP, RNN_DIM)).astype(jnp.float32) / 0.9
        dm2 = jax.random.bernoulli(k4, 0.9, (T, BP, RNN_DIM)).astype(jnp.float32) / 0.9
    else:
        dm1 = jnp.ones((T, BP, RNN_DIM), jnp.float32)
        dm2 = jnp.ones((T, BP, RNN_DIM), jnp.float32)

    w = _prepare_weights(params)

    vmem = pl.BlockSpec(memory_space=pltpu.MemorySpace.VMEM)
    out = pl.pallas_call(
        _make_kernel(T, BP),
        out_shape=jax.ShapeDtypeStruct((T, BP, MEL_IN), jnp.float32),
        in_specs=[vmem] * 18,
        out_specs=vmem,
        scratch_shapes=[pltpu.VMEM((T, BP, GATE_DIM), jnp.float32),
                        pltpu.VMEM((T, BP, RNN_DIM), jnp.float32)],
    )(x_flat, dur_flat, pm1, pm2, dm1, dm2,
      w["pre_w1"], w["pre_w2"],
      w["w1xp"], w["w1xd"], w["w1h"], w["b1"],
      w["w2x"], w["w2h"], w["b2"],
      w["wp_h"], w["wp_d"], w["bp"])

    # strip batch padding, then reshape exactly like the PyTorch module
    mel = out[:, :B, :]                           # (T, B, MEL_IN)
    mel = jnp.transpose(mel, (1, 0, 2))           # (B, T, MEL_IN)
    mel = mel.reshape(B, T * N_FRAMES, N_MEL)     # (B, T*nf, n_mel)
    return jnp.transpose(mel, (0, 2, 1))          # (B, n_mel, T*nf)


if __name__ == "__main__":
    key = jax.random.PRNGKey(0)
    k_in, k_mel, k_par, k_drop = jax.random.split(key, 4)

    B, T = 2, 4                       # batch, decoder steps
    T_MEL = T * N_FRAMES              # mel-spec time dimension

    duration_outputs = jax.random.normal(k_in, (B, T, DUR_DIM), jnp.float32)
    decoder_inputs = jax.random.normal(k_mel, (B, N_MEL, T_MEL), jnp.float32)
    memory_lengths = jnp.array([T, T - 1], jnp.int32)   # unused downstream

    params = init_params(k_par)

    mel_out = decoder_forward(duration_outputs, decoder_inputs,
                              memory_lengths, params, k_drop, training=True)
    mel_out = jax.block_until_ready(mel_out)

    assert mel_out.shape == (B, N_MEL, T_MEL), mel_out.shape
    assert bool(jnp.all(jnp.isfinite(mel_out)))
    print("KERNEL_OK")
</pallas_src>

<mosaic_0001>
module attributes {stable_mosaic.version = 11 : i64} {
  func.func @kernel(%arg0: memref<32x16xf32, #tpu.memory_space<vmem>>, %arg1: memref<32x24xf32, #tpu.memory_space<vmem>>, %arg2: memref<32x32xf32, #tpu.memory_space<vmem>>, %arg3: memref<32x32xf32, #tpu.memory_space<vmem>>, %arg4: memref<4x8x32xf32, #tpu.memory_space<vmem>>, %arg5: memref<4x8x32xf32, #tpu.memory_space<vmem>>, %arg6: memref<16x32xbf16, #tpu.memory_space<vmem>>, %arg7: memref<32x32xbf16, #tpu.memory_space<vmem>>, %arg8: memref<32x128xbf16, #tpu.memory_space<vmem>>, %arg9: memref<24x128xbf16, #tpu.memory_space<vmem>>, %arg10: memref<32x128xbf16, #tpu.memory_space<vmem>>, %arg11: memref<1x128xf32, #tpu.memory_space<vmem>>, %arg12: memref<32x128xbf16, #tpu.memory_space<vmem>>, %arg13: memref<32x128xbf16, #tpu.memory_space<vmem>>, %arg14: memref<1x128xf32, #tpu.memory_space<vmem>>, %arg15: memref<32x16xbf16, #tpu.memory_space<vmem>>, %arg16: memref<24x16xbf16, #tpu.memory_space<vmem>>, %arg17: memref<1x16xf32, #tpu.memory_space<vmem>>, %arg18: memref<4x8x16xf32, #tpu.memory_space<vmem>>, %arg19: memref<4x8x128xf32, #tpu.memory_space<vmem>>, %arg20: memref<4x8x32xf32, #tpu.memory_space<vmem>>) attributes {dimension_semantics = [], scalar_prefetch = 0 : i64, scratch_operands = 2 : i64, tpu.core_type = #tpu.core_type<tc>} {
    %c0 = arith.constant 0 : index
    %c0_0 = arith.constant 0 : index
    %0 = vector.load %arg0[%c0, %c0_0] : memref<32x16xf32, #tpu.memory_space<vmem>>, vector<32x16xf32>
    %1 = arith.truncf %0 : vector<32x16xf32> to vector<32x16xbf16>
    %c0_1 = arith.constant 0 : index
    %c0_2 = arith.constant 0 : index
    %2 = vector.load %arg6[%c0_1, %c0_2] : memref<16x32xbf16, #tpu.memory_space<vmem>>, vector<16x32xbf16>
    %cst = arith.constant dense<0.000000e+00> : vector<32x32xf32>
    %3 = tpu.matmul %1, %2, %cst {dimension_numbers = #tpu.dot_dimension_numbers<[1], [0], [0], [1], [0, 0, 1, 1], [], []>} : vector<32x16xbf16>, vector<16x32xbf16>, vector<32x32xf32> -> vector<32x32xf32>
    %cst_3 = arith.constant 0.000000e+00 : f32
    %4 = vector.broadcast %cst_3 : f32 to vector<32x32xf32>
    %5 = arith.maximumf %3, %4 : vector<32x32xf32>
    %c0_4 = arith.constant 0 : index
    %c0_5 = arith.constant 0 : index
    %6 = vector.load %arg2[%c0_4, %c0_5] : memref<32x32xf32, #tpu.memory_space<vmem>>, vector<32x32xf32>
    %7 = arith.mulf %5, %6 : vector<32x32xf32>
    %8 = arith.truncf %7 : vector<32x32xf32> to vector<32x32xbf16>
    %c0_6 = arith.constant 0 : index
    %c0_7 = arith.constant 0 : index
    %9 = vector.load %arg7[%c0_6, %c0_7] : memref<32x32xbf16, #tpu.memory_space<vmem>>, vector<32x32xbf16>
    %cst_8 = arith.constant dense<0.000000e+00> : vector<32x32xf32>
    %10 = tpu.matmul %8, %9, %cst_8 {dimension_numbers = #tpu.dot_dimension_numbers<[1], [0], [0], [1], [0, 0, 1, 1], [], []>} : vector<32x32xbf16>, vector<32x32xbf16>, vector<32x32xf32> -> vector<32x32xf32>
    %cst_9 = arith.constant 0.000000e+00 : f32
    %11 = vector.broadcast %cst_9 : f32 to vector<32x32xf32>
    %12 = arith.maximumf %10, %11 : vector<32x32xf32>
    %c0_10 = arith.constant 0 : index
    %c0_11 = arith.constant 0 : index
    %13 = vector.load %arg3[%c0_10, %c0_11] : memref<32x32xf32, #tpu.memory_space<vmem>>, vector<32x32xf32>
    %14 = arith.mulf %12, %13 : vector<32x32xf32>
    %c0_12 = arith.constant 0 : index
    %c0_13 = arith.constant 0 : index
    %15 = vector.load %arg1[%c0_12, %c0_13] : memref<32x24xf32, #tpu.memory_space<vmem>>, vector<32x24xf32>
    %16 = arith.truncf %15 : vector<32x24xf32> to vector<32x24xbf16>
    %17 = arith.truncf %14 : vector<32x32xf32> to vector<32x32xbf16>
    %c0_14 = arith.constant 0 : index
    %c0_15 = arith.constant 0 : index
    %18 = vector.load %arg8[%c0_14, %c0_15] : memref<32x128xbf16, #tpu.memory_space<vmem>>, vector<32x128xbf16>
    %cst_16 = arith.constant dense<0.000000e+00> : vector<32x128xf32>
    %19 = tpu.matmul %17, %18, %cst_16 {dimension_numbers = #tpu.dot_dimension_numbers<[1], [0], [0], [1], [0, 0, 1, 1], [], []>} : vector<32x32xbf16>, vector<32x128xbf16>, vector<32x128xf32> -> vector<32x128xf32>
    %c0_17 = arith.constant 0 : index
    %c0_18 = arith.constant 0 : index
    %20 = vector.load %arg9[%c0_17, %c0_18] : memref<24x128xbf16, #tpu.memory_space<vmem>>, vector<24x128xbf16>
    %cst_19 = arith.constant dense<0.000000e+00> : vector<32x128xf32>
    %21 = tpu.matmul %16, %20, %cst_19 {dimension_numbers = #tpu.dot_dimension_numbers<[1], [0], [0], [1], [0, 0, 1, 1], [], []>} : vector<32x24xbf16>, vector<24x128xbf16>, vector<32x128xf32> -> vector<32x128xf32>
    %22 = arith.addf %19, %21 : vector<32x128xf32>
    %c0_20 = arith.constant 0 : index
    %c0_21 = arith.constant 0 : index
    %23 = vector.load %arg11[%c0_20, %c0_21] : memref<1x128xf32, #tpu.memory_space<vmem>>, vector<1x128xf32>
    %24 = vector.broadcast %23 : vector<1x128xf32> to vector<32x128xf32>
    %25 = arith.addf %22, %24 : vector<32x128xf32>
    %26 = vector.shape_cast %25 : vector<32x128xf32> to vector<4x8x128xf32>
    %c0_22 = arith.constant 0 : index
    %c0_23 = arith.constant 0 : index
    %c0_24 = arith.constant 0 : index
    %27 = vector.load %arg19[%c0_22, %c0_23, %c0_24] : memref<4x8x128xf32, #tpu.memory_space<vmem>>, vector<4x8x128xf32>
    tpu.vector_store %arg19[%c0_22, %c0_23, %c0_24], %26 {strides = array<i32>} : memref<4x8x128xf32, #tpu.memory_space<vmem>>, vector<4x8x128xf32>,
    %c0_25 = arith.constant 0 : index
    %c0_26 = arith.constant 0 : index
    %28 = vector.load %arg16[%c0_25, %c0_26] : memref<24x16xbf16, #tpu.memory_space<vmem>>, vector<24x16xbf16>
    %cst_27 = arith.constant dense<0.000000e+00> : vector<32x16xf32>
    %29 = tpu.matmul %16, %28, %cst_27 {dimension_numbers = #tpu.dot_dimension_numbers<[1], [0], [0], [1], [0, 0, 1, 1], [], []>} : vector<32x24xbf16>, vector<24x16xbf16>, vector<32x16xf32> -> vector<32x16xf32>
    %c0_28 = arith.constant 0 : index
    %c0_29 = arith.constant 0 : index
    %30 = vector.load %arg17[%c0_28, %c0_29] : memref<1x16xf32, #tpu.memory_space<vmem>>, vector<1x16xf32>
    %31 = vector.broadcast %30 : vector<1x16xf32> to vector<32x16xf32>
    %32 = arith.addf %29, %31 : vector<32x16xf32>
    %33 = tpu.iota {dimensions = array<i32: 1>} : vector<8x128xi32>
    %c64_i32 = arith.constant 64 : i32
    %34 = vector.broadcast %c64_i32 : i32 to vector<8x128xi32>
    %35 = arith.cmpi sge, %33, %34 : vector<8x128xi32>
    %c96_i32 = arith.constant 96 : i32
    %36 = vector.broadcast %c96_i32 : i32 to vector<8x128xi32>
    %37 = arith.cmpi slt, %33, %36 : vector<8x128xi32>
    %38 = arith.andi %35, %37 : vector<8x128xi1>
    %c0_30 = arith.constant 0 : index
    %c0_31 = arith.constant 0 : index
    %39 = vector.load %arg14[%c0_30, %c0_31] : memref<1x128xf32, #tpu.memory_space<vmem>>, vector<1x128xf32>
    %40 = vector.shape_cast %39 : vector<1x128xf32> to vector<1x128xf32>
    %41 = vector.broadcast %40 : vector<1x128xf32> to vector<8x128xf32>
    %c0_32 = arith.constant 0 : index
    %c0_33 = arith.constant 0 : index
    %42 = vector.load %arg10[%c0_32, %c0_33] : memref<32x128xbf16, #tpu.memory_space<vmem>>, vector<32x128xbf16>
    %c0_34 = arith.constant 0 : index
    %c0_35 = arith.constant 0 : index
    %43 = vector.load %arg12[%c0_34, %c0_35] : memref<32x128xbf16, #tpu.memory_space<vmem>>, vector<32x128xbf16>
    %c0_36 = arith.constant 0 : index
    %c0_37 = arith.constant 0 : index
    %44 = vector.load %arg13[%c0_36, %c0_37] : memref<32x128xbf16, #tpu.memory_space<vmem>>, vector<32x128xbf16>
    %cst_38 = arith.constant 0.000000e+00 : f32
    %45 = vector.broadcast %cst_38 : f32 to vector<8x32xf32>
    %c0_i32 = arith.constant 0 : i32
    %46 = arith.index_cast %c0_i32 : i32 to index
    %c0_39 = arith.constant 0 : index
    %c0_40 = arith.constant 0 : index
    %47 = vector.load %arg19[%46, %c0_39, %c0_40] : memref<4x8x128xf32, #tpu.memory_space<vmem>>, vector<1x8x128xf32>
    %48 = vector.shape_cast %47 : vector<1x8x128xf32> to vector<8x128xf32>
    %49 = arith.truncf %45 : vector<8x32xf32> to vector<8x32xbf16>
    %cst_41 = arith.constant dense<0.000000e+00> : vector<8x128xf32>
    %50 = tpu.matmul %49, %42, %cst_41 {dimension_numbers = #tpu.dot_dimension_numbers<[1], [0], [0], [1], [0, 0, 1, 1], [], []>} : vector<8x32xbf16>, vector<32x128xbf16>, vector<8x128xf32> -> vector<8x128xf32>
    %51 = arith.addf %48, %50 : vector<8x128xf32>
    %52 = arith.negf %51 : vector<8x128xf32>
    %53 = math.exp %52 : vector<8x128xf32>
    %cst_42 = arith.constant 1.000000e+00 : f32
    %54 = vector.broadcast %cst_42 : f32 to vector<8x128xf32>
    %55 = arith.addf %54, %53 : vector<8x128xf32>
    %56 = arith.divf %54, %55 : vector<8x128xf32>
    %cst_43 = arith.constant 2.000000e+00 : f32
    %57 = vector.broadcast %cst_43 : f32 to vector<8x128xf32>
    %58 = arith.mulf %57, %56 : vector<8x128xf32>
    %cst_44 = arith.constant 1.000000e+00 : f32
    %59 = vector.broadcast %cst_44 : f32 to vector<8x128xf32>
    %60 = arith.subf %58, %59 : vector<8x128xf32>
    %61 = arith.select %38, %60, %56 : vector<8x128xi1>, vector<8x128xf32>
    %62 = vector.extract_strided_slice %61 {offsets = [0, 0], sizes = [8, 32], strides = [1, 1]} : vector<8x128xf32> to vector<8x32xf32>
    %63 = vector.extract_strided_slice %61 {offsets = [0, 32], sizes = [8, 32], strides = [1, 1]} : vector<8x128xf32> to vector<8x32xf32>
    %64 = vector.extract_strided_slice %61 {offsets = [0, 64], sizes = [8, 32], strides = [1, 1]} : vector<8x128xf32> to vector<8x32xf32>
    %65 = vector.extract_strided_slice %61 {offsets = [0, 96], sizes = [8, 32], strides = [1, 1]} : vector<8x128xf32> to vector<8x32xf32>
    %66 = arith.mulf %63, %45 : vector<8x32xf32>
    %67 = arith.mulf %62, %64 : vector<8x32xf32>
    %68 = arith.addf %66, %67 : vector<8x32xf32>
    %69 = math.tanh %68 : vector<8x32xf32>
    %70 = arith.mulf %65, %69 : vector<8x32xf32>
    %71 = arith.index_cast %c0_i32 : i32 to index
    %c0_45 = arith.constant 0 : index
    %c0_46 = arith.constant 0 : index
    %72 = vector.load %arg4[%71, %c0_45, %c0_46] : memref<4x8x32xf32, #tpu.memory_space<vmem>>, vector<1x8x32xf32>
    %73 = vector.shape_cast %72 : vector<1x8x32xf32> to vector<8x32xf32>
    %74 = arith.mulf %70, %73 : vector<8x32xf32>
    %75 = arith.truncf %74 : vector<8x32xf32> to vector<8x32xbf16>
    %cst_47 = arith.constant dense<0.000000e+00> : vector<8x128xf32>
    %76 = tpu.matmul %75, %43, %cst_47 {dimension_numbers = #tpu.dot_dimension_numbers<[1], [0], [0], [1], [0, 0, 1, 1], [], []>} : vector<8x32xbf16>, vector<32x128xbf16>, vector<8x128xf32> -> vector<8x128xf32>
    %77 = arith.truncf %45 : vector<8x32xf32> to vector<8x32xbf16>
    %cst_48 = arith.constant dense<0.000000e+00> : vector<8x128xf32>
    %78 = tpu.matmul %77, %44, %cst_48 {dimension_numbers = #tpu.dot_dimension_numbers<[1], [0], [0], [1], [0, 0, 1, 1], [], []>} : vector<8x32xbf16>, vector<32x128xbf16>, vector<8x128xf32> -> vector<8x128xf32>
    %79 = arith.addf %76, %78 : vector<8x128xf32>
    %80 = arith.addf %79, %41 : vector<8x128xf32>
    %81 = arith.negf %80 : vector<8x128xf32>
    %82 = math.exp %81 : vector<8x128xf32>
    %cst_49 = arith.constant 1.000000e+00 : f32
    %83 = vector.broadcast %cst_49 : f32 to vector<8x128xf32>
    %84 = arith.addf %83, %82 : vector<8x128xf32>
    %85 = arith.divf %83, %84 : vector<8x128xf32>
    %cst_50 = arith.constant 2.000000e+00 : f32
    %86 = vector.broadcast %cst_50 : f32 to vector<8x128xf32>
    %87 = arith.mulf %86, %85 : vector<8x128xf32>
    %cst_51 = arith.constant 1.000000e+00 : f32
    %88 = vector.broadcast %cst_51 : f32 to vector<8x128xf32>
    %89 = arith.subf %87, %88 : vector<8x128xf32>
    %90 = arith.select %38, %89, %85 : vector<8x128xi1>, vector<8x128xf32>
    %91 = vector.extract_strided_slice %90 {offsets = [0, 0], sizes = [8, 32], strides = [1, 1]} : vector<8x128xf32> to vector<8x32xf32>
    %92 = vector.extract_strided_slice %90 {offsets = [0, 32], sizes = [8, 32], strides = [1, 1]} : vector<8x128xf32> to vector<8x32xf32>
    %93 = vector.extract_strided_slice %90 {offsets = [0, 64], sizes = [8, 32], strides = [1, 1]} : vector<8x128xf32> to vector<8x32xf32>
    %94 = vector.extract_strided_slice %90 {offsets = [0, 96], sizes = [8, 32], strides = [1, 1]} : vector<8x128xf32> to vector<8x32xf32>
    %95 = arith.mulf %92, %45 : vector<8x32xf32>
    %96 = arith.mulf %91, %93 : vector<8x32xf32>
    %97 = arith.addf %95, %96 : vector<8x32xf32>
    %98 = math.tanh %97 : vector<8x32xf32>
    %99 = arith.mulf %94, %98 : vector<8x32xf32>
    %100 = arith.index_cast %c0_i32 : i32 to index
    %c0_52 = arith.constant 0 : index
    %c0_53 = arith.constant 0 : index
    %101 = vector.load %arg5[%100, %c0_52, %c0_53] : memref<4x8x32xf32, #tpu.memory_space<vmem>>, vector<1x8x32xf32>
    %102 = vector.shape_cast %101 : vector<1x8x32xf32> to vector<8x32xf32>
    %103 = arith.mulf %99, %102 : vector<8x32xf32>
    %104 = arith.index_cast %c0_i32 : i32 to index
    %c0_54 = arith.constant 0 : index
    %c0_55 = arith.constant 0 : index
    %105 = vector.load %arg20[%104, %c0_54, %c0_55] : memref<4x8x32xf32, #tpu.memory_space<vmem>>, vector<1x8x32xf32>
    %106 = vector.shape_cast %105 : vector<1x8x32xf32> to vector<8x32xf32>
    %107 = vector.shape_cast %103 : vector<8x32xf32> to vector<1x8x32xf32>
    tpu.vector_store %arg20[%104, %c0_54, %c0_55], %107 {strides = array<i32>} : memref<4x8x32xf32, #tpu.memory_space<vmem>>, vector<1x8x32xf32>,
    %c1_i32 = arith.constant 1 : i32
    %108 = arith.index_cast %c1_i32 : i32 to index
    %c0_56 = arith.constant 0 : index
    %c0_57 = arith.constant 0 : index
    %109 = vector.load %arg19[%108, %c0_56, %c0_57] : memref<4x8x128xf32, #tpu.memory_space<vmem>>, vector<1x8x128xf32>
    %110 = vector.shape_cast %109 : vector<1x8x128xf32> to vector<8x128xf32>
    %111 = arith.truncf %74 : vector<8x32xf32> to vector<8x32xbf16>
    %cst_58 = arith.constant dense<0.000000e+00> : vector<8x128xf32>
    %112 = tpu.matmul %111, %42, %cst_58 {dimension_numbers = #tpu.dot_dimension_numbers<[1], [0], [0], [1], [0, 0, 1, 1], [], []>} : vector<8x32xbf16>, vector<32x128xbf16>, vector<8x128xf32> -> vector<8x128xf32>
    %113 = arith.addf %110, %112 : vector<8x128xf32>
    %114 = arith.negf %113 : vector<8x128xf32>
    %115 = math.exp %114 : vector<8x128xf32>
    %cst_59 = arith.constant 1.000000e+00 : f32
    %116 = vector.broadcast %cst_59 : f32 to vector<8x128xf32>
    %117 = arith.addf %116, %115 : vector<8x128xf32>
    %118 = arith.divf %116, %117 : vector<8x128xf32>
    %cst_60 = arith.constant 2.000000e+00 : f32
    %119 = vector.broadcast %cst_60 : f32 to vector<8x128xf32>
    %120 = arith.mulf %119, %118 : vector<8x128xf32>
    %cst_61 = arith.constant 1.000000e+00 : f32
    %121 = vector.broadcast %cst_61 : f32 to vector<8x128xf32>
    %122 = arith.subf %120, %121 : vector<8x128xf32>
    %123 = arith.select %38, %122, %118 : vector<8x128xi1>, vector<8x128xf32>
    %124 = vector.extract_strided_slice %123 {offsets = [0, 0], sizes = [8, 32], strides = [1, 1]} : vector<8x128xf32> to vector<8x32xf32>
    %125 = vector.extract_strided_slice %123 {offsets = [0, 32], sizes = [8, 32], strides = [1, 1]} : vector<8x128xf32> to vector<8x32xf32>
    %126 = vector.extract_strided_slice %123 {offsets = [0, 64], sizes = [8, 32], strides = [1, 1]} : vector<8x128xf32> to vector<8x32xf32>
    %127 = vector.extract_strided_slice %123 {offsets = [0, 96], sizes = [8, 32], strides = [1, 1]} : vector<8x128xf32> to vector<8x32xf32>
    %128 = arith.mulf %125, %68 : vector<8x32xf32>
    %129 = arith.mulf %124, %126 : vector<8x32xf32>
    %130 = arith.addf %128, %129 : vector<8x32xf32>
    %131 = math.tanh %130 : vector<8x32xf32>
    %132 = arith.mulf %127, %131 : vector<8x32xf32>
    %133 = arith.index_cast %c1_i32 : i32 to index
    %c0_62 = arith.constant 0 : index
    %c0_63 = arith.constant 0 : index
    %134 = vector.load %arg4[%133, %c0_62, %c0_63] : memref<4x8x32xf32, #tpu.memory_space<vmem>>, vector<1x8x32xf32>
    %135 = vector.shape_cast %134 : vector<1x8x32xf32> to vector<8x32xf32>
    %136 = arith.mulf %132, %135 : vector<8x32xf32>
    %137 = arith.truncf %136 : vector<8x32xf32> to vector<8x32xbf16>
    %cst_64 = arith.constant dense<0.000000e+00> : vector<8x128xf32>
    %138 = tpu.matmul %137, %43, %cst_64 {dimension_numbers = #tpu.dot_dimension_numbers<[1], [0], [0], [1], [0, 0, 1, 1], [], []>} : vector<8x32xbf16>, vector<32x128xbf16>, vector<8x128xf32> -> vector<8x128xf32>
    %139 = arith.truncf %103 : vector<8x32xf32> to vector<8x32xbf16>
    %cst_65 = arith.constant dense<0.000000e+00> : vector<8x128xf32>
    %140 = tpu.matmul %139, %44, %cst_65 {dimension_numbers = #tpu.dot_dimension_numbers<[1], [0], [0], [1], [0, 0, 1, 1], [], []>} : vector<8x32xbf16>, vector<32x128xbf16>, vector<8x128xf32> -> vector<8x128xf32>
    %141 = arith.addf %138, %140 : vector<8x128xf32>
    %142 = arith.addf %141, %41 : vector<8x128xf32>
    %143 = arith.negf %142 : vector<8x128xf32>
    %144 = math.exp %143 : vector<8x128xf32>
    %cst_66 = arith.constant 1.000000e+00 : f32
    %145 = vector.broadcast %cst_66 : f32 to vector<8x128xf32>
    %146 = arith.addf %145, %144 : vector<8x128xf32>
    %147 = arith.divf %145, %146 : vector<8x128xf32>
    %cst_67 = arith.constant 2.000000e+00 : f32
    %148 = vector.broadcast %cst_67 : f32 to vector<8x128xf32>
    %149 = arith.mulf %148, %147 : vector<8x128xf32>
    %cst_68 = arith.constant 1.000000e+00 : f32
    %150 = vector.broadcast %cst_68 : f32 to vector<8x128xf32>
    %151 = arith.subf %149, %150 : vector<8x128xf32>
    %152 = arith.select %38, %151, %147 : vector<8x128xi1>, vector<8x128xf32>
    %153 = vector.extract_strided_slice %152 {offsets = [0, 0], sizes = [8, 32], strides = [1, 1]} : vector<8x128xf32> to vector<8x32xf32>
    %154 = vector.extract_strided_slice %152 {offsets = [0, 32], sizes = [8, 32], strides = [1, 1]} : vector<8x128xf32> to vector<8x32xf32>
    %155 = vector.extract_strided_slice %152 {offsets = [0, 64], sizes = [8, 32], strides = [1, 1]} : vector<8x128xf32> to vector<8x32xf32>
    %156 = vector.extract_strided_slice %152 {offsets = [0, 96], sizes = [8, 32], strides = [1, 1]} : vector<8x128xf32> to vector<8x32xf32>
    %157 = arith.mulf %154, %97 : vector<8x32xf32>
    %158 = arith.mulf %153, %155 : vector<8x32xf32>
    %159 = arith.addf %157, %158 : vector<8x32xf32>
    %160 = math.tanh %159 : vector<8x32xf32>
    %161 = arith.mulf %156, %160 : vector<8x32xf32>
    %162 = arith.index_cast %c1_i32 : i32 to index
    %c0_69 = arith.constant 0 : index
    %c0_70 = arith.constant 0 : index
    %163 = vector.load %arg5[%162, %c0_69, %c0_70] : memref<4x8x32xf32, #tpu.memory_space<vmem>>, vector<1x8x32xf32>
    %164 = vector.shape_cast %163 : vector<1x8x32xf32> to vector<8x32xf32>
    %165 = arith.mulf %161, %164 : vector<8x32xf32>
    %166 = arith.index_cast %c1_i32 : i32 to index
    %c0_71 = arith.constant 0 : index
    %c0_72 = arith.constant 0 : index
    %167 = vector.load %arg20[%166, %c0_71, %c0_72] : memref<4x8x32xf32, #tpu.memory_space<vmem>>, vector<1x8x32xf32>
    %168 = vector.shape_cast %167 : vector<1x8x32xf32> to vector<8x32xf32>
    %169 = vector.shape_cast %165 : vector<8x32xf32> to vector<1x8x32xf32>
    tpu.vector_store %arg20[%166, %c0_71, %c0_72], %169 {strides = array<i32>} : memref<4x8x32xf32, #tpu.memory_space<vmem>>, vector<1x8x32xf32>,
    %c2_i32 = arith.constant 2 : i32
    %170 = arith.index_cast %c2_i32 : i32 to index
    %c0_73 = arith.constant 0 : index
    %c0_74 = arith.constant 0 : index
    %171 = vector.load %arg19[%170, %c0_73, %c0_74] : memref<4x8x128xf32, #tpu.memory_space<vmem>>, vector<1x8x128xf32>
    %172 = vector.shape_cast %171 : vector<1x8x128xf32> to vector<8x128xf32>
    %173 = arith.truncf %136 : vector<8x32xf32> to vector<8x32xbf16>
    %cst_75 = arith.constant dense<0.000000e+00> : vector<8x128xf32>
    %174 = tpu.matmul %173, %42, %cst_75 {dimension_numbers = #tpu.dot_dimension_numbers<[1], [0], [0], [1], [0, 0, 1, 1], [], []>} : vector<8x32xbf16>, vector<32x128xbf16>, vector<8x128xf32> -> vector<8x128xf32>
    %175 = arith.addf %172, %174 : vector<8x128xf32>
    %176 = arith.negf %175 : vector<8x128xf32>
    %177 = math.exp %176 : vector<8x128xf32>
    %cst_76 = arith.constant 1.000000e+00 : f32
    %178 = vector.broadcast %cst_76 : f32 to vector<8x128xf32>
    %179 = arith.addf %178, %177 : vector<8x128xf32>
    %180 = arith.divf %178, %179 : vector<8x128xf32>
    %cst_77 = arith.constant 2.000000e+00 : f32
    %181 = vector.broadcast %cst_77 : f32 to vector<8x128xf32>
    %182 = arith.mulf %181, %180 : vector<8x128xf32>
    %cst_78 = arith.constant 1.000000e+00 : f32
    %183 = vector.broadcast %cst_78 : f32 to vector<8x128xf32>
    %184 = arith.subf %182, %183 : vector<8x128xf32>
    %185 = arith.select %38, %184, %180 : vector<8x128xi1>, vector<8x128xf32>
    %186 = vector.extract_strided_slice %185 {offsets = [0, 0], sizes = [8, 32], strides = [1, 1]} : vector<8x128xf32> to vector<8x32xf32>
    %187 = vector.extract_strided_slice %185 {offsets = [0, 32], sizes = [8, 32], strides = [1, 1]} : vector<8x128xf32> to vector<8x32xf32>
    %188 = vector.extract_strided_slice %185 {offsets = [0, 64], sizes = [8, 32], strides = [1, 1]} : vector<8x128xf32> to vector<8x32xf32>
    %189 = vector.extract_strided_slice %185 {offsets = [0, 96], sizes = [8, 32], strides = [1, 1]} : vector<8x128xf32> to vector<8x32xf32>
    %190 = arith.mulf %187, %130 : vector<8x32xf32>
    %191 = arith.mulf %186, %188 : vector<8x32xf32>
    %192 = arith.addf %190, %191 : vector<8x32xf32>
    %193 = math.tanh %192 : vector<8x32xf32>
    %194 = arith.mulf %189, %193 : vector<8x32xf32>
    %195 = arith.index_cast %c2_i32 : i32 to index
    %c0_79 = arith.constant 0 : index
    %c0_80 = arith.constant 0 : index
    %196 = vector.load %arg4[%195, %c0_79, %c0_80] : memref<4x8x32xf32, #tpu.memory_space<vmem>>, vector<1x8x32xf32>
    %197 = vector.shape_cast %196 : vector<1x8x32xf32> to vector<8x32xf32>
    %198 = arith.mulf %194, %197 : vector<8x32xf32>
    %199 = arith.truncf %198 : vector<8x32xf32> to vector<8x32xbf16>
    %cst_81 = arith.constant dense<0.000000e+00> : vector<8x128xf32>
    %200 = tpu.matmul %199, %43, %cst_81 {dimension_numbers = #tpu.dot_dimension_numbers<[1], [0], [0], [1], [0, 0, 1, 1], [], []>} : vector<8x32xbf16>, vector<32x128xbf16>, vector<8x128xf32> -> vector<8x128xf32>
    %201 = arith.truncf %165 : vector<8x32xf32> to vector<8x32xbf16>
    %cst_82 = arith.constant dense<0.000000e+00> : vector<8x128xf32>
    %202 = tpu.matmul %201, %44, %cst_82 {dimension_numbers = #tpu.dot_dimension_numbers<[1], [0], [0], [1], [0, 0, 1, 1], [], []>} : vector<8x32xbf16>, vector<32x128xbf16>, vector<8x128xf32> -> vector<8x128xf32>
    %203 = arith.addf %200, %202 : vector<8x128xf32>
    %204 = arith.addf %203, %41 : vector<8x128xf32>
    %205 = arith.negf %204 : vector<8x128xf32>
    %206 = math.exp %205 : vector<8x128xf32>
    %cst_83 = arith.constant 1.000000e+00 : f32
    %207 = vector.broadcast %cst_83 : f32 to vector<8x128xf32>
    %208 = arith.addf %207, %206 : vector<8x128xf32>
    %209 = arith.divf %207, %208 : vector<8x128xf32>
    %cst_84 = arith.constant 2.000000e+00 : f32
    %210 = vector.broadcast %cst_84 : f32 to vector<8x128xf32>
    %211 = arith.mulf %210, %209 : vector<8x128xf32>
    %cst_85 = arith.constant 1.000000e+00 : f32
    %212 = vector.broadcast %cst_85 : f32 to vector<8x128xf32>
    %213 = arith.subf %211, %212 : vector<8x128xf32>
    %214 = arith.select %38, %213, %209 : vector<8x128xi1>, vector<8x128xf32>
    %215 = vector.extract_strided_slice %214 {offsets = [0, 0], sizes = [8, 32], strides = [1, 1]} : vector<8x128xf32> to vector<8x32xf32>
    %216 = vector.extract_strided_slice %214 {offsets = [0, 32], sizes = [8, 32], strides = [1, 1]} : vector<8x128xf32> to vector<8x32xf32>
    %217 = vector.extract_strided_slice %214 {offsets = [0, 64], sizes = [8, 32], strides = [1, 1]} : vector<8x128xf32> to vector<8x32xf32>
    %218 = vector.extract_strided_slice %214 {offsets = [0, 96], sizes = [8, 32], strides = [1, 1]} : vector<8x128xf32> to vector<8x32xf32>
    %219 = arith.mulf %216, %159 : vector<8x32xf32>
    %220 = arith.mulf %215, %217 : vector<8x32xf32>
    %221 = arith.addf %219, %220 : vector<8x32xf32>
    %222 = math.tanh %221 : vector<8x32xf32>
    %223 = arith.mulf %218, %222 : vector<8x32xf32>
    %224 = arith.index_cast %c2_i32 : i32 to index
    %c0_86 = arith.constant 0 : index
    %c0_87 = arith.constant 0 : index
    %225 = vector.load %arg5[%224, %c0_86, %c0_87] : memref<4x8x32xf32, #tpu.memory_space<vmem>>, vector<1x8x32xf32>
    %226 = vector.shape_cast %225 : vector<1x8x32xf32> to vector<8x32xf32>
    %227 = arith.mulf %223, %226 : vector<8x32xf32>
    %228 = arith.index_cast %c2_i32 : i32 to index
    %c0_88 = arith.constant 0 : index
    %c0_89 = arith.constant 0 : index
    %229 = vector.load %arg20[%228, %c0_88, %c0_89] : memref<4x8x32xf32, #tpu.memory_space<vmem>>, vector<1x8x32xf32>
    %230 = vector.shape_cast %229 : vector<1x8x32xf32> to vector<8x32xf32>
    %231 = vector.shape_cast %227 : vector<8x32xf32> to vector<1x8x32xf32>
    tpu.vector_store %arg20[%228, %c0_88, %c0_89], %231 {strides = array<i32>} : memref<4x8x32xf32, #tpu.memory_space<vmem>>, vector<1x8x32xf32>,
    %c3_i32 = arith.constant 3 : i32
    %232 = arith.index_cast %c3_i32 : i32 to index
    %c0_90 = arith.constant 0 : index
    %c0_91 = arith.constant 0 : index
    %233 = vector.load %arg19[%232, %c0_90, %c0_91] : memref<4x8x128xf32, #tpu.memory_space<vmem>>, vector<1x8x128xf32>
    %234 = vector.shape_cast %233 : vector<1x8x128xf32> to vector<8x128xf32>
    %235 = arith.truncf %198 : vector<8x32xf32> to vector<8x32xbf16>
    %cst_92 = arith.constant dense<0.000000e+00> : vector<8x128xf32>
    %236 = tpu.matmul %235, %42, %cst_92 {dimension_numbers = #tpu.dot_dimension_numbers<[1], [0], [0], [1], [0, 0, 1, 1], [], []>} : vector<8x32xbf16>, vector<32x128xbf16>, vector<8x128xf32> -> vector<8x128xf32>
    %237 = arith.addf %234, %236 : vector<8x128xf32>
    %238 = arith.negf %237 : vector<8x128xf32>
    %239 = math.exp %238 : vector<8x128xf32>
    %cst_93 = arith.constant 1.000000e+00 : f32
    %240 = vector.broadcast %cst_93 : f32 to vector<8x128xf32>
    %241 = arith.addf %240, %239 : vector<8x128xf32>
    %242 = arith.divf %240, %241 : vector<8x128xf32>
    %cst_94 = arith.constant 2.000000e+00 : f32
    %243 = vector.broadcast %cst_94 : f32 to vector<8x128xf32>
    %244 = arith.mulf %243, %242 : vector<8x128xf32>
    %cst_95 = arith.constant 1.000000e+00 : f32
    %245 = vector.broadcast %cst_95 : f32 to vector<8x128xf32>
    %246 = arith.subf %244, %245 : vector<8x128xf32>
    %247 = arith.select %38, %246, %242 : vector<8x128xi1>, vector<8x128xf32>
    %248 = vector.extract_strided_slice %247 {offsets = [0, 0], sizes = [8, 32], strides = [1, 1]} : vector<8x128xf32> to vector<8x32xf32>
    %249 = vector.extract_strided_slice %247 {offsets = [0, 32], sizes = [8, 32], strides = [1, 1]} : vector<8x128xf32> to vector<8x32xf32>
    %250 = vector.extract_strided_slice %247 {offsets = [0, 64], sizes = [8, 32], strides = [1, 1]} : vector<8x128xf32> to vector<8x32xf32>
    %251 = vector.extract_strided_slice %247 {offsets = [0, 96], sizes = [8, 32], strides = [1, 1]} : vector<8x128xf32> to vector<8x32xf32>
    %252 = arith.mulf %249, %192 : vector<8x32xf32>
    %253 = arith.mulf %248, %250 : vector<8x32xf32>
    %254 = arith.addf %252, %253 : vector<8x32xf32>
    %255 = math.tanh %254 : vector<8x32xf32>
    %256 = arith.mulf %251, %255 : vector<8x32xf32>
    %257 = arith.index_cast %c3_i32 : i32 to index
    %c0_96 = arith.constant 0 : index
    %c0_97 = arith.constant 0 : index
    %258 = vector.load %arg4[%257, %c0_96, %c0_97] : memref<4x8x32xf32, #tpu.memory_space<vmem>>, vector<1x8x32xf32>
    %259 = vector.shape_cast %258 : vector<1x8x32xf32> to vector<8x32xf32>
    %260 = arith.mulf %256, %259 : vector<8x32xf32>
    %261 = arith.truncf %260 : vector<8x32xf32> to vector<8x32xbf16>
    %cst_98 = arith.constant dense<0.000000e+00> : vector<8x128xf32>
    %262 = tpu.matmul %261, %43, %cst_98 {dimension_numbers = #tpu.dot_dimension_numbers<[1], [0], [0], [1], [0, 0, 1, 1], [], []>} : vector<8x32xbf16>, vector<32x128xbf16>, vector<8x128xf32> -> vector<8x128xf32>
    %263 = arith.truncf %227 : vector<8x32xf32> to vector<8x32xbf16>
    %cst_99 = arith.constant dense<0.000000e+00> : vector<8x128xf32>
    %264 = tpu.matmul %263, %44, %cst_99 {dimension_numbers = #tpu.dot_dimension_numbers<[1], [0], [0], [1], [0, 0, 1, 1], [], []>} : vector<8x32xbf16>, vector<32x128xbf16>, vector<8x128xf32> -> vector<8x128xf32>
    %265 = arith.addf %262, %264 : vector<8x128xf32>
    %266 = arith.addf %265, %41 : vector<8x128xf32>
    %267 = arith.negf %266 : vector<8x128xf32>
    %268 = math.exp %267 : vector<8x128xf32>
    %cst_100 = arith.constant 1.000000e+00 : f32
    %269 = vector.broadcast %cst_100 : f32 to vector<8x128xf32>
    %270 = arith.addf %269, %268 : vector<8x128xf32>
    %271 = arith.divf %269, %270 : vector<8x128xf32>
    %cst_101 = arith.constant 2.000000e+00 : f32
    %272 = vector.broadcast %cst_101 : f32 to vector<8x128xf32>
    %273 = arith.mulf %272, %271 : vector<8x128xf32>
    %cst_102 = arith.constant 1.000000e+00 : f32
    %274 = vector.broadcast %cst_102 : f32 to vector<8x128xf32>
    %275 = arith.subf %273, %274 : vector<8x128xf32>
    %276 = arith.select %38, %275, %271 : vector<8x128xi1>, vector<8x128xf32>
    %277 = vector.extract_strided_slice %276 {offsets = [0, 0], sizes = [8, 32], strides = [1, 1]} : vector<8x128xf32> to vector<8x32xf32>
    %278 = vector.extract_strided_slice %276 {offsets = [0, 32], sizes = [8, 32], strides = [1, 1]} : vector<8x128xf32> to vector<8x32xf32>
    %279 = vector.extract_strided_slice %276 {offsets = [0, 64], sizes = [8, 32], strides = [1, 1]} : vector<8x128xf32> to vector<8x32xf32>
    %280 = vector.extract_strided_slice %276 {offsets = [0, 96], sizes = [8, 32], strides = [1, 1]} : vector<8x128xf32> to vector<8x32xf32>
    %281 = arith.mulf %278, %221 : vector<8x32xf32>
    %282 = arith.mulf %277, %279 : vector<8x32xf32>
    %283 = arith.addf %281, %282 : vector<8x32xf32>
    %284 = math.tanh %283 : vector<8x32xf32>
    %285 = arith.mulf %280, %284 : vector<8x32xf32>
    %286 = arith.index_cast %c3_i32 : i32 to index
    %c0_103 = arith.constant 0 : index
    %c0_104 = arith.constant 0 : index
    %287 = vector.load %arg5[%286, %c0_103, %c0_104] : memref<4x8x32xf32, #tpu.memory_space<vmem>>, vector<1x8x32xf32>
    %288 = vector.shape_cast %287 : vector<1x8x32xf32> to vector<8x32xf32>
    %289 = arith.mulf %285, %288 : vector<8x32xf32>
    %290 = arith.index_cast %c3_i32 : i32 to index
    %c0_105 = arith.constant 0 : index
    %c0_106 = arith.constant 0 : index
    %291 = vector.load %arg20[%290, %c0_105, %c0_106] : memref<4x8x32xf32, #tpu.memory_space<vmem>>, vector<1x8x32xf32>
    %292 = vector.shape_cast %291 : vector<1x8x32xf32> to vector<8x32xf32>
    %293 = vector.shape_cast %289 : vector<8x32xf32> to vector<1x8x32xf32>
    tpu.vector_store %arg20[%290, %c0_105, %c0_106], %293 {strides = array<i32>} : memref<4x8x32xf32, #tpu.memory_space<vmem>>, vector<1x8x32xf32>,
    %c4_i32 = arith.constant 4 : i32
    %c0_107 = arith.constant 0 : index
    %c0_108 = arith.constant 0 : index
    %c0_109 = arith.constant 0 : index
    %294 = vector.load %arg20[%c0_107, %c0_108, %c0_109] : memref<4x8x32xf32, #tpu.memory_space<vmem>>, vector<4x8x32xf32>
    %295 = vector.shape_cast %294 : vector<4x8x32xf32> to vector<32x32xf32>
    %296 = arith.truncf %295 : vector<32x32xf32> to vector<32x32xbf16>
    %c0_110 = arith.constant 0 : index
    %c0_111 = arith.constant 0 : index
    %297 = vector.load %arg15[%c0_110, %c0_111] : memref<32x16xbf16, #tpu.memory_space<vmem>>, vector<32x16xbf16>
    %cst_112 = arith.constant dense<0.000000e+00> : vector<32x16xf32>
    %298 = tpu.matmul %296, %297, %cst_112 {dimension_numbers = #tpu.dot_dimension_numbers<[1], [0], [0], [1], [0, 0, 1, 1], [], []>} : vector<32x32xbf16>, vector<32x16xbf16>, vector<32x16xf32> -> vector<32x16xf32>
    %299 = arith.addf %298, %32 : vector<32x16xf32>
    %300 = vector.shape_cast %299 : vector<32x16xf32> to vector<4x8x16xf32>
    %c0_113 = arith.constant 0 : index
    %c0_114 = arith.constant 0 : index
    %c0_115 = arith.constant 0 : index
    %301 = vector.load %arg18[%c0_113, %c0_114, %c0_115] : memref<4x8x16xf32, #tpu.memory_space<vmem>>, vector<4x8x16xf32>
    tpu.vector_store %arg18[%c0_113, %c0_114, %c0_115], %300 {strides = array<i32>} : memref<4x8x16xf32, #tpu.memory_space<vmem>>, vector<4x8x16xf32>,
    return
  }
}

</mosaic_0001>

<bundles_post_ra>
// kernel: tpu_custom_call.1
= control target key start
LH: loop header
LB: loop body
LE: loop exit
PB: predicated region body
PF: predicated region fallthrough
CT: control target
= control target key end

     0   :  { %s1933_s0 = inlined_call_operand.vmem [shape: f32[32,16], index: 0, kind: input, shape index: {}]   ;;  %s1934_s1 = inlined_call_operand.vmem [shape: f32[32,24], index: 1, kind: input, shape index: {}]   ;;  %s1935_s2 = inlined_call_operand.vmem [shape: f32[32,32], index: 2, kind: input, shape index: {}]   ;;  %s1936_s3 = inlined_call_operand.vmem [shape: f32[32,32], index: 3, kind: input, shape index: {}]   ;;  %s1937_s4 = inlined_call_operand.hbm [shape: f32[4,8,32], index: 4, kind: input, shape index: {}]   ;;  %s1938_s5 = inlined_call_operand.hbm [shape: f32[4,8,32], index: 5, kind: input, shape index: {}]   ;;  %s1939_s6 = inlined_call_operand.vmem [shape: bf16[16,32], index: 6, kind: input, shape index: {}]   ;;  %s1940_s7 = inlined_call_operand.vmem [shape: bf16[32,32], index: 7, kind: input, shape index: {}]   ;;  %s1941_s8 = inlined_call_operand.vmem [shape: bf16[32,128], index: 8, kind: input, shape index: {}]   ;;  %s1942_s9 = inlined_call_operand.hbm [shape: bf16[24,128], index: 9, kind: input, shape index: {}]   ;;  %s1943_s10 = inlined_call_operand.hbm [shape: bf16[32,128], index: 10, kind: input, shape index: {}]   ;;  %s1944_s11 = inlined_call_operand.vmem [shape: f32[1,128], index: 11, kind: input, shape index: {}]   ;;  %s1945_s12 = inlined_call_operand.hbm [shape: bf16[32,128], index: 12, kind: input, shape index: {}]   ;;  %s1946_s13 = inlined_call_operand.hbm [shape: bf16[32,128], index: 13, kind: input, shape index: {}]   ;;  %s1947_s14 = inlined_call_operand.vmem [shape: f32[1,128], index: 14, kind: input, shape index: {}]   ;;  %s1948_s15 = inlined_call_operand.vmem [shape: bf16[32,16], index: 15, kind: input, shape index: {}]   ;;  %s1949_s16 = inlined_call_operand.vmem [shape: bf16[24,16], index: 16, kind: input, shape index: {}]   ;;  %s1950_s17 = inlined_call_operand.vmem [shape: f32[1,16], index: 17, kind: input, shape index: {}]   ;;  %s1951_s18 = inlined_call_operand.hbm [shape: f32[4,8,16], index: 18, kind: output, shape index: {}]  }
   0x1   :  { %1955 = sst [smem:[#allocation21_spill]] %s1933_s0 }
   0x2   :  { %1956 = sst [smem:[#allocation22_spill]] %s1934_s1 }
   0x3   :  { %1957 = sst [smem:[#allocation23_spill]] %s1935_s2 }
   0x4   :  { %23 = vsyncpa [#allocation5], 0 }
   0x5   :  { %24 = vsyncpa [#allocation8], 0 }
   0x6   :  { %25 = vsyncpa [#allocation11], 0 }
   0x7   :  { %26 = vsyncpa [#allocation14], 0 }
   0x8   :  { %27 = vsyncpa [#allocation6], 0  ;;  %s53_s29 = sshll.u32 %s1938_s5, 4  ;;  %s1504_s30 = smov [#allocation7]   ;;  %s54_s29 = int_to_ptr.hbm [resolvable:$true] %s53_s29 }
   0x9   :  { %s55_s0 = sshll.u32 %s1504_s30, 4  ;;  %s1505_s19 = smov 128   ;;  %s56_s0 = int_to_ptr.vmem [resolvable:$true] %s55_s0 }
   0xa   :  { %s1506_s1 = smov 8   ;;  %s85_s22 = sshll.u32 %s1943_s10, 4  ;;  %s86_s22 = int_to_ptr.hbm [resolvable:$true] %s85_s22 }
   0xb   :  { %61 = dma.hbm_to_vmem [thread:$0]  %s54_s29, 512, %s56_s0, [#allocation8], %s1505_s19, %s1505_s19, %s1506_s1  }
   0xc   :  { %s1507_s2 = smov [#allocation10]   ;;  %s40_s5 = sshll.u32 %s1937_s4, 4  ;;  %s41_s5 = int_to_ptr.hbm [resolvable:$true] %s40_s5 }
   0xd   :  { %s87_s23 = sshll.u32 %s1507_s2, 4  ;;  %s1508_s26 = smov 64   ;;  %s88_s23 = int_to_ptr.vmem [resolvable:$true] %s87_s23 }
   0xe   :  { %s1509_s27 = smov 4   ;;  %s72_s30 = sshll.u32 %s1942_s9, 4  ;;  %s73_s30 = int_to_ptr.hbm [resolvable:$true] %s72_s30 }
   0xf   :  { %93 = dma.hbm_to_vmem [thread:$0]  %s86_s22, 256, %s88_s23, [#allocation11], %s1508_s26, %s1508_s26, %s1509_s27  }
  0x10   :  { %s1510_s0 = smov [#allocation4]   ;;  %s1511_s4 = smov [#allocation9]  }
  0x11   :  { %s42_s10 = sshll.u32 %s1510_s0, 4  ;;  %s74_s20 = sshll.u32 %s1511_s4, 4  ;;  %s43_s10 = int_to_ptr.vmem [resolvable:$true] %s42_s10  ;;  %s75_s20 = int_to_ptr.vmem [resolvable:$true] %s74_s20 }
  0x12   :  { %48 = dma.hbm_to_vmem [thread:$0]  %s41_s5, 512, %s43_s10, [#allocation5], %s1505_s19, %s1505_s19, %s1506_s1  }
  0x13   :  { %s100_s24 = sshll.u32 %s1945_s12, 4  ;;  %s113_s23 = sshll.u32 %s1946_s13, 4  ;;  %s101_s24 = int_to_ptr.hbm [resolvable:$true] %s100_s24  ;;  %s114_s23 = int_to_ptr.hbm [resolvable:$true] %s113_s23 }
  0x14   :  { %80 = dma.hbm_to_vmem [thread:$0]  %s73_s30, 192, %s75_s20, [#allocation8], %s1508_s26, %s1508_s26, %s1509_s27  }
  0x15   :  { %s1512_s25 = smov [#allocation12]   ;;  %s1513_s5 = smov [#allocation13]  }
  0x16   :  { %s102_s28 = sshll.u32 %s1512_s25, 4  ;;  %s115_s29 = sshll.u32 %s1513_s5, 4  ;;  %s103_s28 = int_to_ptr.vmem [resolvable:$true] %s102_s28  ;;  %s116_s29 = int_to_ptr.vmem [resolvable:$true] %s115_s29 }
  0x17   :  { %108 = dma.hbm_to_vmem [thread:$0]  %s101_s24, 256, %s103_s28, [#allocation11], %s1508_s26, %s1508_s26, %s1509_s27  }
  0x18   :  { %121 = dma.hbm_to_vmem [thread:$0]  %s114_s23, 256, %s116_s29, [#allocation14], %s1508_s26, %s1508_s26, %s1509_s27  }
  0x19   :  { %1494 = dma.done.wait [#allocation5], 512  }
  0x1a   :  { %1495 = vsyncadd [#allocation5], 4294966784 }
  0x1b   :  { %1496 = dma.done.wait [#allocation8], 704  }
  0x1c   :  { %1497 = vsyncadd [#allocation8], 4294966592 }
  0x1d   :  { %1498 = dma.done.wait [#allocation11], 512  }
  0x1e   :  { %1499 = vsyncadd [#allocation11], 4294966784 }
  0x1f   :  { %1500 = dma.done.wait [#allocation14], 256  }
  0x20   :  { %1501 = vsyncadd [#allocation14], 4294967040  ;;  %v1244_v0 = vld [vmem:[%s1939_s6] sm:$0xff]  ;;  %s1958_s10 = sld [smem:[#allocation21_spill]]  ;;  %vm169_vm0 = vcmask 130048   ;;  %v1246_v7 = vld [vmem:[%s1940_s7 + $0x8] sm:$0xff] }
  0x21   :  { %183 = vmatpush.bf16.msra.mxu0 %v1244_v0  ;;  %238 = vmatpush.bf16.msra.mxu1 %v1246_v7  ;;  %v1245_v8 = vld [vmem:[%s1940_s7] sm:$0xff]  ;;  %v277_v9 = vld [vmem:[#allocation9 + $0x8] sm:$0xf]  ;;  %v1668_v12 = vld [vmem:[#allocation10 + $0x8] sm:$0xff]  ;;  %vm294_vm1 = vcmask 1043456   ;;  %s1959_s5 = sld [smem:[#allocation22_spill]] }
  0x22   :  { %v283_v11 = vunpack.c.l.b16 %v277_v9  ;;  %v1249_v15 = vld [vmem:[#allocation9] sm:$0xff]  ;;  %v1248_v18 = vld [vmem:[%s1941_s8 + $0x8] sm:$0xff]  ;;  %vm287_vm2 = vcmask 195584   ;;  %vm225_vm3 = vcmask 261120   ;;  %v1514_v42 = vmov 0   ;;  %v257_v54 = vld [vmem:[%s1936_s3 + $0x10] sm:$0xff] }
  0x23   :  { %v1247_v39 = vld [vmem:[%s1941_s8] sm:$0xff]  ;;  %v1712_v41 = vld [vmem:[#allocation10] sm:$0xff]  ;;  %v258_v56 = vld [vmem:[%s1936_s3 + $0x18] sm:$0xff]  ;;  %s1130_s8 = sshll.u32 %s1951_s18, 4  ;;  %s1131_s8 = int_to_ptr.hbm [resolvable:$true] %s1130_s8 }
  0x24   :  { %v285_v13 = vpack.c.b16 %v283_v11, %v283_v11  ;;  %v255_v45 = vld [vmem:[%s1936_s3] sm:$0xff]  ;;  %v256_v47 = vld [vmem:[%s1936_s3 + $0x8] sm:$0xff]  ;;  %s1515_s3 = smov 32  }
  0x25   :  { %239 = vmatpush.bf16.msra.mxu1 %v1245_v8 }
  0x26   :  { %v155_v1 = vld [vmem:[%s1958_s10] sm:$0xff]  ;;  %v156_v2 = vld [vmem:[%s1958_s10 + $0x8] sm:$0xff]  ;;  %v157_v4 = vld [vmem:[%s1958_s10 + $0x10] sm:$0xff]  ;;  %v296_v14 = vsel %vm294_vm1, %v285_v13, 0 }
  0x27   :  { %v159_v3 = vpack.c.bf16 %v156_v2, %v155_v1  ;;  %v158_v5 = vld [vmem:[%s1958_s10 + $0x18] sm:$0xff]  ;;  %1259 = vmatpush.bf16.msra.mxu3 %v296_v14  ;;  %v265_v16 = vld [vmem:[%s1959_s5 + $0x10] sm:$0xff]  ;;  %304 = vmatpush.bf16.msra.mxu2 %v296_v14  ;;  %s1960_s10 = sld [smem:[#allocation23_spill]]  ;;  %v263_v37 = vld [vmem:[%s1959_s5] sm:$0xff] }
  0x28   :  { %v160_v6 = vpack.c.bf16 %v158_v5, %v157_v4  ;;  %v266_v17 = vld [vmem:[%s1959_s5 + $0x18] sm:$0xff]  ;;  %v264_v38 = vld [vmem:[%s1959_s5 + $0x8] sm:$0xff]  ;;  %v1735_v1 = vld [vmem:[%s1944_s11] ss:$0 sm:$0xff]  ;;  %s1516_s11 = smov 96  }
  0x29   :  { %1150 = vmatmul.msk.bf16.vlgmr.msra.gmra.mxu0 %vm169_vm0, %v159_v3  ;;  %447 = vmatpush.bf16.msrb.mxu1 %v1668_v12  ;;  %v1687_v23 = vpack.c.bf16 %v266_v17, %v265_v16  ;;  %v1708_v40 = vpack.c.bf16 %v264_v38, %v263_v37 }
  0x2b   :  { %1260 = vmatpush.bf16.msra.mxu3 %v1249_v15  ;;  %305 = vmatpush.bf16.msra.mxu2 %v1249_v15 }
  0x2d   :  { %v199_v20 = vld [vmem:[%s1960_s10] sm:$0xff]  ;;  %v200_v22 = vld [vmem:[%s1960_s10 + $0x8] sm:$0xff]  ;;  %v201_v30 = vld [vmem:[%s1960_s10 + $0x10] sm:$0xff]  ;;  %448 = vmatpush.bf16.msrb.mxu1 %v1712_v41 }
  0x2e   :  { %1167 = vmatmul.msk.bf16.vlgmr.msra.gmra.mxu3 %vm287_vm2, %v1687_v23  ;;  %v202_v32 = vld [vmem:[%s1960_s10 + $0x18] sm:$0xff]  ;;  %1166 = vmatmul.msk.bf16.vlgmr.msra.gmra.mxu2 %vm287_vm2, %v1708_v40 }
  0x2f   :  { %341 = vmatpush.bf16.msrb.mxu3 %v1248_v18  ;;  %v404_v18 = vlaneseq }
  0x33   :  { %342 = vmatpush.bf16.msrb.mxu3 %v1247_v39 }
  0x39   :  { %1151 = vmatmul.msk.bf16.gmra.mxu0 %vm169_vm0, %v160_v6 }
  0xa6   :  { %v185_v10 = vpop.f32.mrf.mxu0 }
  0xa7   :  { %v195_v19 = vmax.f32 %v185_v10, 0.0 }
  0xa9   :  { %v203_v25 = vmul.f32 %v199_v20, %v195_v19 }
  0xae   :  { %v187_v21 = vpop.f32.mrf.mxu0 }
  0xaf   :  { %v196_v24 = vmax.f32 %v187_v21, 0.0 }
  0xb1   :  { %v204_v26 = vmul.f32 %v200_v22, %v196_v24  ;;  %v312_v63 = vpop.f32.mrf.mxu3  ;;  %v307_v2 = vpop.f32.mrf.mxu2  ;;  %v405_v24 = vand.u32 127, %v404_v18 }
  0xb3   :  { %v207_v27 = vpack.c.bf16 %v204_v26, %v203_v25  ;;  %vm406_vm7 = vcmp.ge.s32.totalorder %v405_v24, 64  ;;  %vm407_vm8 = vcmp.lt.s32.totalorder %v405_v24, 96 }
  0xb4   :  { %vm1746_vm10 = vmand %vm406_vm7, %vm407_vm8 }
  0xb5   :  { %1160 = vmatmul.msk.bf16.vlgmr.msra.gmra.mxu1 %vm225_vm3, %v207_v27 }
  0xb6   :  { %v190_v28 = vpop.f32.mrf.mxu0  ;;  %616 = vmatpush.bf16.msra.mxu1 %v1668_v12 }
  0xb7   :  { %v197_v29 = vmax.f32 %v190_v28, 0.0 }
  0xb9   :  { %v205_v33 = vmul.f32 %v201_v30, %v197_v29  ;;  %v314_v0 = vpop.f32.mrf.mxu3 }
  0xba   :  { %617 = vmatpush.bf16.msra.mxu1 %v1712_v41 }
  0xbe   :  { %v192_v31 = vpop.f32.mrf.mxu0 }
  0xbf   :  { %v198_v34 = vmax.f32 %v192_v31, 0.0 }
  0xc1   :  { %v206_v35 = vmul.f32 %v202_v32, %v198_v34 }
  0xc3   :  { %v208_v36 = vpack.c.bf16 %v206_v35, %v205_v33 }
  0xc5   :  { %1161 = vmatmul.msk.bf16.gmra.mxu1 %vm225_vm3, %v208_v36 }
  0xd5   :  { %449 = vmatmul.bf16.vlgmr.msrb.gmra.mxu1 %v1514_v42 }
 0x132   :  { %v241_v43 = vpop.f32.mrf.mxu1 }
 0x133   :  { %v251_v44 = vmax.f32 %v241_v43, 0.0 }
 0x135   :  { %v259_v49 = vmul.f32 %v255_v45, %v251_v44  ;;  %v494_v44 = vld [vmem:[#allocation4] sm:$0xff] }
 0x136   :  { %v1254_v45 = vld [vmem:[#allocation12 + $0x8] sm:$0xff] }
 0x137   :  { %550 = vmatpush.bf16.msra.mxu3 %v1254_v45 }
 0x13a   :  { %v243_v46 = vpop.f32.mrf.mxu1 }
 0x13b   :  { %v252_v48 = vmax.f32 %v243_v46, 0.0  ;;  %v1759_v46 = vld [vmem:[#allocation13 + $0x8] sm:$0xff] }
 0x13c   :  { %519 = vmatpush.bf16.msrb.mxu2 %v1759_v46  ;;  %839 = vmatpush.bf16.msrb.mxu1 %v1759_v46 }
 0x13d   :  { %v260_v50 = vmul.f32 %v256_v47, %v252_v48  ;;  %v1253_v47 = vld [vmem:[#allocation12] sm:$0xff]  ;;  %v1762_v48 = vld [vmem:[#allocation13] sm:$0xff] }
 0x13e   :  { %551 = vmatpush.bf16.msra.mxu3 %v1253_v47 }
 0x13f   :  { %v269_v51 = vpack.c.bf16 %v260_v50, %v259_v49 }
 0x140   :  { %520 = vmatpush.bf16.msrb.mxu2 %v1762_v48  ;;  %840 = vmatpush.bf16.msrb.mxu1 %v1762_v48 }
 0x141   :  { %1176 = vmatmul.msk.bf16.vlgmr.msrb.gmra.mxu3 %vm225_vm3, %v269_v51 }
 0x142   :  { %v246_v52 = vpop.f32.mrf.mxu1  ;;  %703 = vmatpush.bf16.msrb.mxu3 %v1254_v45 }
 0x143   :  { %v253_v53 = vmax.f32 %v246_v52, 0.0  ;;  %521 = vmatmul.bf16.vlgmr.msrb.gmra.mxu2 %v1514_v42  ;;  %v309_v42 = vpop.f32.mrf.mxu2 }
 0x144   :  { %684 = vmatpush.bf16.msra.mxu2 %v1759_v46 }
 0x145   :  { %v261_v57 = vmul.f32 %v257_v54, %v253_v53 }
 0x146   :  { %704 = vmatpush.bf16.msrb.mxu3 %v1253_v47 }
 0x148   :  { %685 = vmatpush.bf16.msra.mxu2 %v1762_v48 }
 0x14a   :  { %v248_v55 = vpop.f32.mrf.mxu1 }
 0x14b   :  { %v254_v58 = vmax.f32 %v248_v55, 0.0 }
 0x14c   :  { %858 = vmatpush.bf16.msrb.mxu2 %v1254_v45 }
 0x14d   :  { %v262_v59 = vmul.f32 %v258_v56, %v254_v58 }
 0x14f   :  { %v270_v60 = vpack.c.bf16 %v262_v59, %v261_v57 }
 0x150   :  { %859 = vmatpush.bf16.msrb.mxu2 %v1253_v47 }
 0x151   :  { %1177 = vmatmul.msk.bf16.gmra.mxu3 %vm225_vm3, %v270_v60 }
 0x152   :  { %v450_v61 = vpop.f32.mrf.mxu1 }
 0x15a   :  { %v452_v62 = vpop.f32.mrf.mxu1 }
 0x15b   :  { %v1780_v62 = vld [vmem:[%s1947_s14] ss:$0 sm:$0xff] }
 0x1c4   :  { %v344_v3 = vpop.f32.mrf.mxu3 }
 0x1c5   :  { %v345_v4 = vadd.f32 %v344_v3, %v307_v2 }
 0x1c6   :  { %v522_v55 = vpop.f32.mrf.mxu2 }
 0x1c7   :  { %v358_v5 = vadd.f32 %v1735_v1, %v345_v4 }
 0x1c9   :  { %v454_v6 = vadd.f32 %v450_v61, %v358_v5 }
 0x1cb   :  { %v1192_v7 = vmul.f32 -1.442695, %v454_v6 }
 0x1cc   :  { %v1738_v8 = vpop.f32.mrf.mxu3 }
 0x1cd   :  { %1278 = vpow2.f32 %v1192_v7  ;;  %v347_v57 = vadd.f32 %v1738_v8, %v309_v42 }
 0x1ce   :  { %v524_v56 = vpop.f32.mrf.mxu2 }
 0x1cf   :  { %v359_v58 = vadd.f32 %v1735_v1, %v347_v57 }
 0x1d3   :  { %v1279_v9 = vpop.eup %1278 }
 0x1d4   :  { %v458_v10 = vadd.f32 1.0, %v1279_v9  ;;  %v349_v11 = vpop.f32.mrf.mxu3 }
 0x1d5   :  { %v350_v13 = vadd.f32 %v349_v11, %v312_v63 }
 0x1d6   :  { %1280 = vrcp.f32 %v458_v10  ;;  %v470_v22 = vand.u32 2147483648, %v458_v10  ;;  %v468_v26 = vand.u32 2147483647, %v458_v10  ;;  %vm464_vm5 = vweird.f32 %v458_v10 }
 0x1d7   :  { %v1741_v14 = vadd.f32 %v1735_v1, %v350_v13 }
 0x1d8   :  { %v471_v28 = vor.u32 1.1754944e-38, %v470_v22  ;;  %vm469_vm9 = vcmp.eq.f32.partialorder %v468_v26, 8.507059e+37 }
 0x1dc   :  { %v1281_v15 = vpop.eup %1280  ;;  %v351_v16 = vpop.f32.mrf.mxu3 }
 0x1dd   :  { %v352_v17 = vadd.f32 %v351_v16, %v314_v0  ;;  %v460_v19 = vmul.f32 %v1281_v15, %v458_v10  ;;  %vm465_vm4 = vweird.f32 %v1281_v15 }
 0x1de   :  { %vm466_vm6 = vmor %vm464_vm5, %vm465_vm4 }
 0x1df   :  { %v461_v20 = vsub.f32 1.0, %v460_v19  ;;  %v1744_v21 = vadd.f32 %v1735_v1, %v352_v17 }
 0x1e1   :  { %v462_v25 = vmul.f32 %v1281_v15, %v461_v20 }
 0x1e3   :  { %v463_v27 = vadd.f32 %v1281_v15, %v462_v25 }
 0x1e5   :  { %v467_v29 = vsel %vm466_vm6, %v1281_v15, %v463_v27 }
 0x1e6   :  { %v472_v30 = vsel %vm469_vm9, %v471_v28, %v467_v29 }
 0x1e7   :  { %v474_v31 = vmul.f32 2.0, %v472_v30 }
 0x1e9   :  { %v1193_v33 = vadd.f32 -1.0, %v474_v31 }
 0x1eb   :  { %v476_v34 = vsel %vm1746_vm10, %v1193_v33, %v472_v30 }
 0x1ec   :  { %479 = vrot.lane.b32.xlu0 %v476_v34, %s1508_s26  ;;  %v477_v37 = vmul.f32 0.0, %v476_v34 }
 0x25e   :  { %v480_v35 = vpop.permute.xlu0 %479 }
 0x25f   :  { %v482_v36 = vmul.f32 %v480_v35, %v476_v34 }
 0x261   :  { %484 = vrot.lane.b32.xlu0 %v482_v36, %s1515_s3 }
 0x2d3   :  { %v485_v38 = vpop.permute.xlu0 %484 }
 0x2d4   :  { %v1754_v39 = vadd.f32 %v485_v38, %v477_v37 }
 0x2d6   :  { %1282 = vtanh.f32 %v1754_v39 }
 0x2dc   :  { %v1283_v43 = vpop.eup %1282 }
 0x2dd   :  { %490 = vrot.lane.b32.xlu1 %v1283_v43, %s1508_s26 }
 0x2e5   :  { %496 = vrot.lane.b32.xlu1 %v494_v44, %s1516_s11 }
 0x34f   :  { %v491_v49 = vpop.permute.xlu1 %490 }
 0x350   :  { %v493_v50 = vmul.f32 %v491_v49, %v476_v34 }
 0x357   :  { %v497_v51 = vpop.permute.xlu1 %496 }
 0x358   :  { %v499_v52 = vmul.f32 %v497_v51, %v493_v50  ;;  %v597_v50 = vld [vmem:[#allocation7] sm:$0xff] }
 0x35a   :  { %v500_v53 = vpack.c.bf16 %v499_v52, %v499_v52 }
 0x35c   :  { %527 = vrot.lane.b32.xlu2 %v500_v53, %s1515_s3 }
 0x3b6   :  { %v528_v54 = vpop.permute.xlu2 %527 }
 0x3b7   :  { %1210 = vmatmul.msk.bf16.vlgmr.msra.gmra.mxu3 %vm225_vm3, %v528_v54  ;;  %1213 = vmatmul.msk.bf16.vlgmr.msra.gmra.mxu1 %vm225_vm3, %v528_v54 }
 0x3b8   :  { %926 = vmatpush.bf16.msra.mxu3 %v1668_v12  ;;  %1013 = vmatpush.bf16.msra.mxu1 %v1254_v45 }
 0x3bc   :  { %927 = vmatpush.bf16.msra.mxu3 %v1712_v41  ;;  %1014 = vmatpush.bf16.msra.mxu1 %v1253_v47 }
 0x434   :  { %v619_v59 = vpop.f32.mrf.mxu1 }
 0x435   :  { %v623_v60 = vadd.f32 %v619_v59, %v359_v58  ;;  %v664_v58 = vld [vmem:[#allocation4 + $0x8] sm:$0xff] }
 0x437   :  { %v1214_v61 = vmul.f32 -1.442695, %v623_v60 }
 0x439   :  { %1284 = vpow2.f32 %v1214_v61 }
 0x43a   :  { %v553_v63 = vpop.f32.mrf.mxu3 }
 0x43b   :  { %v554_v0 = vadd.f32 %v553_v63, %v522_v55  ;;  %v1250_v63 = vld [vmem:[%s1949_s16] sm:$0xff] }
 0x43c   :  { %v621_v2 = vpop.f32.mrf.mxu1 }
 0x43d   :  { %v557_v3 = vadd.f32 %v1780_v62, %v554_v0 }
 0x43f   :  { %v1285_v4 = vpop.eup %1284  ;;  %v1211_v5 = vmul.f32 -1.442695, %v557_v3 }
 0x440   :  { %v627_v6 = vadd.f32 1.0, %v1285_v4 }
 0x441   :  { %1286 = vpow2.f32 %v1211_v5 }
 0x442   :  { %1288 = vrcp.f32 %v627_v6  ;;  %v555_v1 = vpop.f32.mrf.mxu3  ;;  %v639_v13 = vand.u32 2147483648, %v627_v6  ;;  %v637_v16 = vand.u32 2147483647, %v627_v6  ;;  %vm633_vm12 = vweird.f32 %v627_v6 }
 0x444   :  { %v640_v19 = vor.u32 1.1754944e-38, %v639_v13  ;;  %vm638_vm14 = vcmp.eq.f32.partialorder %v637_v16, 8.507059e+37 }
 0x447   :  { %v1287_v7 = vpop.eup %1286 }
 0x448   :  { %v1289_v8 = vpop.eup %1288  ;;  %v561_v9 = vadd.f32 1.0, %v1287_v7 }
 0x449   :  { %v629_v10 = vmul.f32 %v1289_v8, %v627_v6  ;;  %vm634_vm11 = vweird.f32 %v1289_v8 }
 0x44a   :  { %1290 = vrcp.f32 %v561_v9  ;;  %vm635_vm13 = vmor %vm633_vm12, %vm634_vm11  ;;  %v573_v27 = vand.u32 2147483648, %v561_v9  ;;  %v571_v30 = vand.u32 2147483647, %v561_v9  ;;  %vm567_vm4 = vweird.f32 %v561_v9 }
 0x44b   :  { %v630_v11 = vsub.f32 1.0, %v629_v10 }
 0x44c   :  { %v574_v34 = vor.u32 1.1754944e-38, %v573_v27  ;;  %vm572_vm6 = vcmp.eq.f32.partialorder %v571_v30, 8.507059e+37 }
 0x44d   :  { %v631_v15 = vmul.f32 %v1289_v8, %v630_v11 }
 0x44f   :  { %v632_v17 = vadd.f32 %v1289_v8, %v631_v15 }
 0x450   :  { %v1291_v18 = vpop.eup %1290 }
 0x451   :  { %v636_v20 = vsel %vm635_vm13, %v1289_v8, %v632_v17  ;;  %v563_v22 = vmul.f32 %v1291_v18, %v561_v9  ;;  %vm568_vm15 = vweird.f32 %v1291_v18  ;;  %v1833_v9 = vld [vmem:[%s1950_s17] ss:$0 sm:$0xff] }
 0x452   :  { %v641_v24 = vsel %vm638_vm14, %v640_v19, %v636_v20  ;;  %vm569_vm5 = vmor %vm567_vm4, %vm568_vm15 }
 0x453   :  { %v643_v25 = vmul.f32 2.0, %v641_v24  ;;  %v564_v26 = vsub.f32 1.0, %v563_v22 }
 0x455   :  { %v1215_v28 = vadd.f32 -1.0, %v643_v25  ;;  %v565_v29 = vmul.f32 %v1291_v18, %v564_v26 }
 0x457   :  { %v645_v31 = vsel %vm1746_vm10, %v1215_v28, %v641_v24  ;;  %v566_v33 = vadd.f32 %v1291_v18, %v565_v29 }
 0x458   :  { %648 = vrot.lane.b32.xlu0 %v645_v31, %s1508_s26  ;;  %v646_v51 = vmul.f32 %v645_v31, %v1754_v39  ;;  %v368_v39 = vld [vmem:[%s1949_s16 + $0x8] sm:$0xf] }
 0x459   :  { %v570_v35 = vsel %vm569_vm5, %v1291_v18, %v566_v33  ;;  %v378_v59 = vunpack.c.l.b16 %v368_v39 }
 0x45a   :  { %v575_v36 = vsel %vm572_vm6, %v574_v34, %v570_v35 }
 0x45b   :  { %v577_v37 = vmul.f32 2.0, %v575_v36  ;;  %v380_v60 = vpack.c.b16 %v378_v59, %v378_v59 }
 0x45d   :  { %v1212_v38 = vadd.f32 -1.0, %v577_v37  ;;  %v383_v61 = vsel %vm294_vm1, %v380_v60, 0 }
 0x45e   :  { %391 = vmatpush.bf16.msrb.mxu0 %v383_v61 }
 0x45f   :  { %v579_v43 = vsel %vm1746_vm10, %v1212_v38, %v575_v36 }
 0x460   :  { %582 = vrot.lane.b32.xlu2 %v579_v43, %s1508_s26  ;;  %v580_v54 = vmul.f32 0.0, %v579_v43 }
 0x462   :  { %392 = vmatpush.bf16.msrb.mxu0 %v1250_v63 }
 0x465   :  { %1182 = vmatmul.msk.bf16.vlgmr.msrb.gmra.mxu0 %vm287_vm2, %v1708_v40 }
 0x466   :  { %771 = vmatpush.bf16.msra.mxu0 %v1668_v12 }
 0x46a   :  { %772 = vmatpush.bf16.msra.mxu0 %v1712_v41 }
 0x46e   :  { %994 = vmatpush.bf16.msrb.mxu0 %v1759_v46 }
 0x472   :  { %995 = vmatpush.bf16.msrb.mxu0 %v1762_v48 }
 0x475   :  { %1183 = vmatmul.msk.bf16.gmra.mxu0 %vm287_vm2, %v1687_v23 }
 0x4ba   :  { %v583_v44 = vpop.permute.xlu2 %582 }
 0x4bb   :  { %v585_v45 = vmul.f32 %v583_v44, %v579_v43 }
 0x4bd   :  { %587 = vrot.lane.b32.xlu1 %v585_v45, %s1515_s3 }
 0x4ca   :  { %v649_v47 = vpop.permute.xlu0 %648 }
 0x4cb   :  { %v651_v49 = vmul.f32 %v649_v47, %v645_v31 }
 0x4cd   :  { %653 = vrot.lane.b32.xlu2 %v651_v49, %s1515_s3 }
 0x4d5   :  { %599 = vrot.lane.b32.xlu2 %v597_v50, %s1516_s11 }
 0x4e2   :  { %v1825_v48 = vpop.f32.mrf.mxu0 }
 0x4ea   :  { %v1828_v8 = vpop.f32.mrf.mxu0 }
 0x4f2   :  { %v399_v23 = vpop.f32.mrf.mxu0 }
 0x4f3   :  { %v1836_v10 = vadd.f32 %v1833_v9, %v399_v23 }
 0x4fa   :  { %v1838_v11 = vpop.f32.mrf.mxu0 }
 0x527   :  { %v654_v52 = vpop.permute.xlu2 %653 }
 0x528   :  { %v1793_v53 = vadd.f32 %v654_v52, %v646_v51 }
 0x52a   :  { %1292 = vtanh.f32 %v1793_v53 }
 0x52f   :  { %v588_v42 = vpop.permute.xlu1 %587  ;;  %v600_v2 = vpop.permute.xlu2 %599 }
 0x530   :  { %v1293_v55 = vpop.eup %1292  ;;  %v1796_v56 = vadd.f32 %v588_v42, %v580_v54 }
 0x531   :  { %659 = vrot.lane.b32.xlu1 %v1293_v55, %s1508_s26 }
 0x532   :  { %1294 = vtanh.f32 %v1796_v56 }
 0x538   :  { %v1295_v57 = vpop.eup %1294 }
 0x539   :  { %593 = vrot.lane.b32.xlu0 %v1295_v57, %s1508_s26 }
 0x541   :  { %666 = vrot.lane.b32.xlu0 %v664_v58, %s1516_s11 }
 0x5a3   :  { %v660_v5 = vpop.permute.xlu1 %659 }
 0x5a4   :  { %v662_v1 = vmul.f32 %v660_v5, %v645_v31 }
 0x5ab   :  { %v594_v0 = vpop.permute.xlu0 %593 }
 0x5ac   :  { %v596_v3 = vmul.f32 %v594_v0, %v579_v43 }
 0x5ae   :  { %v1815_v4 = vmul.f32 %v600_v2, %v596_v3 }
 0x5b0   :  { %v671_v6 = vpack.c.bf16 %v1815_v4, %v1815_v4 }
 0x5b2   :  { %673 = vrot.lane.b32.xlu1 %v671_v6, %s1515_s3  ;;  %v819_v6 = vld [vmem:[#allocation4 + $0x10] sm:$0xff] }
 0x5b3   :  { %v667_v12 = vpop.permute.xlu0 %666 }
 0x5b4   :  { %v669_v40 = vmul.f32 %v667_v12, %v662_v1 }
 0x5b6   :  { %v670_v41 = vpack.c.bf16 %v669_v40, %v669_v40 }
 0x5b8   :  { %692 = vrot.lane.b32.xlu2 %v670_v41, %s1515_s3 }
 0x612   :  { %v693_v46 = vpop.permute.xlu2 %692 }
 0x613   :  { %1217 = vmatmul.msk.bf16.vlgmr.msrb.gmra.mxu3 %vm225_vm3, %v693_v46  ;;  %1220 = vmatmul.msk.bf16.vlgmr.msra.gmra.mxu0 %vm225_vm3, %v693_v46  ;;  %v751_v46 = vld [vmem:[#allocation7 + $0x8] sm:$0xff] }
 0x624   :  { %v674_v7 = vpop.permute.xlu1 %673 }
 0x625   :  { %1216 = vmatmul.msk.bf16.vlgmr.msra.gmra.mxu2 %vm225_vm3, %v674_v7 }
 0x690   :  { %v774_v13 = vpop.f32.mrf.mxu0 }
 0x691   :  { %v778_v15 = vadd.f32 %v774_v13, %v1741_v14 }
 0x693   :  { %v1221_v16 = vmul.f32 -1.442695, %v778_v15 }
 0x695   :  { %1296 = vpow2.f32 %v1221_v16 }
 0x696   :  { %v706_v17 = vpop.f32.mrf.mxu3 }
 0x698   :  { %v776_v18 = vpop.f32.mrf.mxu0 }
 0x69b   :  { %v1297_v19 = vpop.eup %1296 }
 0x69c   :  { %v782_v20 = vadd.f32 1.0, %v1297_v19 }
 0x69e   :  { %1298 = vrcp.f32 %v782_v20  ;;  %v708_v22 = vpop.f32.mrf.mxu3  ;;  %v794_v28 = vand.u32 2147483648, %v782_v20  ;;  %v792_v31 = vand.u32 2147483647, %v782_v20  ;;  %vm788_vm2 = vweird.f32 %v782_v20 }
 0x6a0   :  { %v795_v34 = vor.u32 1.1754944e-38, %v794_v28  ;;  %vm793_vm8 = vcmp.eq.f32.partialorder %v792_v31, 8.507059e+37 }
 0x6a4   :  { %v1299_v24 = vpop.eup %1298 }
 0x6a5   :  { %v784_v25 = vmul.f32 %v1299_v24, %v782_v20  ;;  %vm789_vm1 = vweird.f32 %v1299_v24 }
 0x6a6   :  { %vm790_vm7 = vmor %vm788_vm2, %vm789_vm1 }
 0x6a7   :  { %v785_v26 = vsub.f32 1.0, %v784_v25 }
 0x6a8   :  { %v687_v27 = vpop.f32.mrf.mxu2 }
 0x6a9   :  { %v707_v29 = vadd.f32 %v706_v17, %v687_v27  ;;  %v786_v30 = vmul.f32 %v1299_v24, %v785_v26 }
 0x6ab   :  { %v710_v33 = vadd.f32 %v1780_v62, %v707_v29  ;;  %v787_v14 = vadd.f32 %v1299_v24, %v786_v30 }
 0x6ad   :  { %v1218_v35 = vmul.f32 -1.442695, %v710_v33  ;;  %v791_v36 = vsel %vm790_vm7, %v1299_v24, %v787_v14 }
 0x6ae   :  { %v796_v37 = vsel %vm793_vm8, %v795_v34, %v791_v36 }
 0x6af   :  { %1300 = vpow2.f32 %v1218_v35  ;;  %v798_v38 = vmul.f32 2.0, %v796_v37 }
 0x6b0   :  { %v689_v43 = vpop.f32.mrf.mxu2 }
 0x6b1   :  { %v1222_v44 = vadd.f32 -1.0, %v798_v38 }
 0x6b3   :  { %v800_v45 = vsel %vm1746_vm10, %v1222_v44, %v796_v37 }
 0x6b4   :  { %803 = vrot.lane.b32.xlu0 %v800_v45, %s1508_s26  ;;  %v801_v1 = vmul.f32 %v800_v45, %v1793_v53 }
 0x6b5   :  { %v1301_v47 = vpop.eup %1300 }
 0x6b6   :  { %v714_v49 = vadd.f32 1.0, %v1301_v47 }
 0x6b8   :  { %1302 = vrcp.f32 %v714_v49  ;;  %v726_v54 = vand.u32 2147483648, %v714_v49  ;;  %v724_v55 = vand.u32 2147483647, %v714_v49  ;;  %vm720_vm11 = vweird.f32 %v714_v49 }
 0x6ba   :  { %v727_v58 = vor.u32 1.1754944e-38, %v726_v54  ;;  %vm725_vm13 = vcmp.eq.f32.partialorder %v724_v55, 8.507059e+37 }
 0x6be   :  { %v1303_v50 = vpop.eup %1302 }
 0x6bf   :  { %v716_v51 = vmul.f32 %v1303_v50, %v714_v49  ;;  %vm721_vm9 = vweird.f32 %v1303_v50 }
 0x6c0   :  { %vm722_vm12 = vmor %vm720_vm11, %vm721_vm9 }
 0x6c1   :  { %v717_v52 = vsub.f32 1.0, %v716_v51 }
 0x6c3   :  { %v718_v42 = vmul.f32 %v1303_v50, %v717_v52 }
 0x6c5   :  { %v719_v57 = vadd.f32 %v1303_v50, %v718_v42 }
 0x6c7   :  { %v723_v39 = vsel %vm722_vm12, %v1303_v50, %v719_v57 }
 0x6c8   :  { %v728_v59 = vsel %vm725_vm13, %v727_v58, %v723_v39 }
 0x6c9   :  { %v730_v60 = vmul.f32 2.0, %v728_v59 }
 0x6cb   :  { %v1219_v61 = vadd.f32 -1.0, %v730_v60 }
 0x6cd   :  { %v732_v63 = vsel %vm1746_vm10, %v1219_v61, %v728_v59 }
 0x6ce   :  { %735 = vrot.lane.b32.xlu1 %v732_v63, %s1508_s26  ;;  %v733_v7 = vmul.f32 %v732_v63, %v1796_v56 }
 0x726   :  { %v804_v0 = vpop.permute.xlu0 %803 }
 0x727   :  { %v806_v2 = vmul.f32 %v804_v0, %v800_v45 }
 0x729   :  { %808 = vrot.lane.b32.xlu2 %v806_v2, %s1515_s3 }
 0x731   :  { %821 = vrot.lane.b32.xlu2 %v819_v6, %s1516_s11 }
 0x740   :  { %v736_v3 = vpop.permute.xlu1 %735 }
 0x741   :  { %v738_v5 = vmul.f32 %v736_v3, %v732_v63 }
 0x743   :  { %740 = vrot.lane.b32.xlu0 %v738_v5, %s1515_s3 }
 0x783   :  { %v809_v12 = vpop.permute.xlu2 %808 }
 0x784   :  { %v1852_v40 = vadd.f32 %v809_v12, %v801_v1 }
 0x786   :  { %1304 = vtanh.f32 %v1852_v40 }
 0x78b   :  { %v822_v16 = vpop.permute.xlu2 %821 }
 0x78c   :  { %v1305_v41 = vpop.eup %1304 }
 0x78d   :  { %814 = vrot.lane.b32.xlu1 %v1305_v41, %s1508_s26 }
 0x795   :  { %753 = vrot.lane.b32.xlu1 %v751_v46, %s1516_s11 }
 0x7b5   :  { %v741_v23 = vpop.permute.xlu0 %740 }
 0x7b6   :  { %v1858_v13 = vadd.f32 %v741_v23, %v733_v7 }
 0x7b8   :  { %1306 = vtanh.f32 %v1858_v13 }
 0x7be   :  { %v1307_v15 = vpop.eup %1306 }
 0x7bf   :  { %746 = vrot.lane.b32.xlu0 %v1307_v15, %s1508_s26 }
 0x7ff   :  { %v815_v53 = vpop.permute.xlu1 %814 }
 0x800   :  { %v817_v17 = vmul.f32 %v815_v53, %v800_v45 }
 0x802   :  { %v824_v18 = vmul.f32 %v822_v16, %v817_v17 }
 0x804   :  { %v825_v19 = vpack.c.bf16 %v824_v18, %v824_v18  ;;  %v906_v18 = vld [vmem:[#allocation7 + $0x10] sm:$0xff] }
 0x806   :  { %847 = vrot.lane.b32.xlu2 %v825_v19, %s1515_s3 }
 0x807   :  { %v754_v22 = vpop.permute.xlu1 %753 }
 0x831   :  { %v747_v20 = vpop.permute.xlu0 %746 }
 0x832   :  { %v749_v24 = vmul.f32 %v747_v20, %v732_v63 }
 0x834   :  { %v1863_v25 = vmul.f32 %v754_v22, %v749_v24 }
 0x836   :  { %v826_v56 = vpack.c.bf16 %v1863_v25, %v1863_v25 }
 0x838   :  { %828 = vrot.lane.b32.xlu0 %v826_v56, %s1515_s3 }
 0x860   :  { %v848_v26 = vpop.permute.xlu2 %847 }
 0x861   :  { %1224 = vmatmul.msk.bf16.vlgmr.msrb.gmra.mxu2 %vm225_vm3, %v848_v26  ;;  %1227 = vmatmul.msk.bf16.vlgmr.msra.gmra.mxu3 %vm225_vm3, %v848_v26 }
 0x8aa   :  { %v829_v27 = vpop.permute.xlu0 %828 }
 0x8ab   :  { %1223 = vmatmul.msk.bf16.vlgmr.msrb.gmra.mxu1 %vm225_vm3, %v829_v27 }
 0x8e4   :  { %v861_v28 = vpop.f32.mrf.mxu2  ;;  %v929_v29 = vpop.f32.mrf.mxu3 }
 0x8e5   :  { %v933_v30 = vadd.f32 %v929_v29, %v1744_v21  ;;  %v974_v29 = vld [vmem:[#allocation4 + $0x18] sm:$0xff] }
 0x8e7   :  { %v1228_v31 = vmul.f32 -1.442695, %v933_v30 }
 0x8e9   :  { %1308 = vpow2.f32 %v1228_v31 }
 0x8ec   :  { %v863_v33 = vpop.f32.mrf.mxu2  ;;  %v931_v14 = vpop.f32.mrf.mxu3 }
 0x8ef   :  { %v1309_v34 = vpop.eup %1308 }
 0x8f0   :  { %v937_v35 = vadd.f32 1.0, %v1309_v34 }
 0x8f2   :  { %1310 = vrcp.f32 %v937_v35  ;;  %v949_v43 = vand.u32 2147483648, %v937_v35  ;;  %v947_v45 = vand.u32 2147483647, %v937_v35  ;;  %vm943_vm15 = vweird.f32 %v937_v35 }
 0x8f4   :  { %v950_v49 = vor.u32 1.1754944e-38, %v949_v43  ;;  %vm948_vm5 = vcmp.eq.f32.partialorder %v947_v45, 8.507059e+37 }
 0x8f8   :  { %v1311_v36 = vpop.eup %1310 }
 0x8f9   :  { %v939_v37 = vmul.f32 %v1311_v36, %v937_v35  ;;  %vm944_vm14 = vweird.f32 %v1311_v36 }
 0x8fa   :  { %vm945_vm4 = vmor %vm943_vm15, %vm944_vm14 }
 0x8fb   :  { %v940_v38 = vsub.f32 1.0, %v939_v37 }
 0x8fd   :  { %v941_v44 = vmul.f32 %v1311_v36, %v940_v38 }
 0x8ff   :  { %v942_v47 = vadd.f32 %v1311_v36, %v941_v44 }
 0x901   :  { %v946_v50 = vsel %vm945_vm4, %v1311_v36, %v942_v47 }
 0x902   :  { %v951_v21 = vsel %vm948_vm5, %v950_v49, %v946_v50 }
 0x903   :  { %v953_v51 = vmul.f32 2.0, %v951_v21 }
 0x905   :  { %v1229_v52 = vadd.f32 -1.0, %v953_v51 }
 0x907   :  { %v955_v54 = vsel %vm1746_vm10, %v1229_v52, %v951_v21 }
 0x908   :  { %958 = vrot.lane.b32.xlu2 %v955_v54, %s1508_s26  ;;  %v956_v19 = vmul.f32 %v955_v54, %v1852_v40 }
 0x928   :  { %v842_v42 = vpop.f32.mrf.mxu1 }
 0x929   :  { %v862_v55 = vadd.f32 %v861_v28, %v842_v42 }
 0x92b   :  { %v865_v57 = vadd.f32 %v1780_v62, %v862_v55 }
 0x92d   :  { %v1225_v58 = vmul.f32 -1.442695, %v865_v57 }
 0x92f   :  { %1312 = vpow2.f32 %v1225_v58 }
 0x930   :  { %v844_v39 = vpop.f32.mrf.mxu1 }
 0x935   :  { %v1313_v59 = vpop.eup %1312 }
 0x936   :  { %v869_v60 = vadd.f32 1.0, %v1313_v59 }
 0x938   :  { %1314 = vrcp.f32 %v869_v60  ;;  %v881_v2 = vand.u32 2147483648, %v869_v60  ;;  %v879_v5 = vand.u32 2147483647, %v869_v60  ;;  %vm875_vm1 = vweird.f32 %v869_v60 }
 0x93a   :  { %v882_v1 = vor.u32 1.1754944e-38, %v881_v2  ;;  %vm880_vm7 = vcmp.eq.f32.partialorder %v879_v5, 8.507059e+37  ;;  %v1061_v5 = vld [vmem:[#allocation7 + $0x18] sm:$0xff] }
 0x93e   :  { %v1315_v61 = vpop.eup %1314 }
 0x93f   :  { %v871_v63 = vmul.f32 %v1315_v61, %v869_v60  ;;  %vm876_vm6 = vweird.f32 %v1315_v61 }
 0x940   :  { %vm877_vm2 = vmor %vm875_vm1, %vm876_vm6 }
 0x941   :  { %v872_v0 = vsub.f32 1.0, %v871_v63 }
 0x943   :  { %v873_v3 = vmul.f32 %v1315_v61, %v872_v0 }
 0x945   :  { %v874_v6 = vadd.f32 %v1315_v61, %v873_v3 }
 0x947   :  { %v878_v12 = vsel %vm877_vm2, %v1315_v61, %v874_v6 }
 0x948   :  { %v883_v41 = vsel %vm880_vm7, %v882_v1, %v878_v12 }
 0x949   :  { %v885_v46 = vmul.f32 2.0, %v883_v41 }
 0x94b   :  { %v1226_v7 = vadd.f32 -1.0, %v885_v46 }
 0x94d   :  { %v887_v23 = vsel %vm1746_vm10, %v1226_v7, %v883_v41 }
 0x94e   :  { %890 = vrot.lane.b32.xlu1 %v887_v23, %s1508_s26  ;;  %v888_v56 = vmul.f32 %v887_v23, %v1858_v13 }
 0x962   :  { %v959_v15 = vpop.permute.xlu2 %958 }
 0x963   :  { %v961_v53 = vmul.f32 %v959_v15, %v955_v54 }
 0x965   :  { %963 = vrot.lane.b32.xlu1 %v961_v53, %s1515_s3  ;;  %v1257_v53 = vld [vmem:[%s1948_s15] sm:$0xff] }
 0x96d   :  { %908 = vrot.lane.b32.xlu1 %v906_v18, %s1516_s11 }
 0x9c0   :  { %v891_v16 = vpop.permute.xlu1 %890 }
 0x9c1   :  { %v893_v17 = vmul.f32 %v891_v16, %v887_v23 }
 0x9c3   :  { %895 = vrot.lane.b32.xlu0 %v893_v17, %s1515_s3 }
 0x9d7   :  { %v964_v20 = vpop.permute.xlu1 %963 }
 0x9d8   :  { %v966_v22 = vadd.f32 %v964_v20, %v956_v19 }
 0x9da   :  { %1316 = vtanh.f32 %v966_v22 }
 0x9df   :  { %v909_v31 = vpop.permute.xlu1 %908 }
 0x9e0   :  { %v1317_v24 = vpop.eup %1316 }
 0x9e1   :  { %969 = vrot.lane.b32.xlu0 %v1317_v24, %s1508_s26 }
 0xa35   :  { %v896_v26 = vpop.permute.xlu0 %895 }
 0xa36   :  { %v898_v27 = vadd.f32 %v896_v26, %v888_v56 }
 0xa38   :  { %1318 = vtanh.f32 %v898_v27 }
 0xa3e   :  { %v1319_v28 = vpop.eup %1318 }
 0xa3f   :  { %901 = vrot.lane.b32.xlu2 %v1319_v28, %s1508_s26  ;;  %v395_v28 = vadd.f32 %v1833_v9, %v1825_v48  ;;  %v402_v48 = vadd.f32 %v1833_v9, %v1838_v11 }
 0xa47   :  { %976 = vrot.lane.b32.xlu2 %v974_v29, %s1516_s11 }
 0xa53   :  { %v970_v14 = vpop.permute.xlu0 %969 }
 0xa54   :  { %v972_v35 = vmul.f32 %v970_v14, %v955_v54 }
 0xa99   :  { %v902_v30 = vpop.permute.xlu2 %901 }
 0xa9a   :  { %v904_v40 = vmul.f32 %v902_v30, %v887_v23 }
 0xa9c   :  { %v911_v33 = vmul.f32 %v909_v31, %v904_v40  ;;  %v397_v31 = vadd.f32 %v1833_v9, %v1828_v8 }
 0xa9e   :  { %v981_v34 = vpack.c.bf16 %v911_v33, %v911_v33 }
 0xaa0   :  { %983 = vrot.lane.b32.xlu0 %v981_v34, %s1515_s3 }
 0xaa1   :  { %v977_v36 = vpop.permute.xlu2 %976 }
 0xaa2   :  { %v979_v13 = vmul.f32 %v977_v36, %v972_v35 }
 0xaa4   :  { %v980_v37 = vpack.c.bf16 %v979_v13, %v979_v13 }
 0xaa6   :  { %1002 = vrot.lane.b32.xlu1 %v980_v37, %s1515_s3 }
 0xb12   :  { %v984_v38 = vpop.permute.xlu0 %983 }
 0xb13   :  { %1230 = vmatmul.msk.bf16.vlgmr.msrb.gmra.mxu0 %vm225_vm3, %v984_v38 }
 0xb18   :  { %v1003_v43 = vpop.permute.xlu1 %1002 }
 0xb19   :  { %1231 = vmatmul.msk.bf16.vlgmr.msra.gmra.mxu1 %vm225_vm3, %v1003_v43 }
 0xb90   :  { %v997_v44 = vpop.f32.mrf.mxu0 }
 0xb96   :  { %v1016_v45 = vpop.f32.mrf.mxu1 }
 0xb97   :  { %v1017_v47 = vadd.f32 %v1016_v45, %v997_v44 }
 0xb98   :  { %v999_v49 = vpop.f32.mrf.mxu0 }
 0xb99   :  { %v1020_v50 = vadd.f32 %v1780_v62, %v1017_v47 }
 0xb9b   :  { %v1232_v21 = vmul.f32 -1.442695, %v1020_v50 }
 0xb9d   :  { %1320 = vpow2.f32 %v1232_v21 }
 0xb9e   :  { %v1018_v51 = vpop.f32.mrf.mxu1 }
 0xba3   :  { %v1321_v52 = vpop.eup %1320 }
 0xba4   :  { %v1024_v54 = vadd.f32 1.0, %v1321_v52 }
 0xba6   :  { %1322 = vrcp.f32 %v1024_v54  ;;  %v1036_v58 = vand.u32 2147483648, %v1024_v54  ;;  %v1034_v59 = vand.u32 2147483647, %v1024_v54  ;;  %vm1030_vm9 = vweird.f32 %v1024_v54 }
 0xba8   :  { %v1037_v61 = vor.u32 1.1754944e-38, %v1036_v58  ;;  %vm1035_vm12 = vcmp.eq.f32.partialorder %v1034_v59, 8.507059e+37 }
 0xbac   :  { %v1323_v42 = vpop.eup %1322 }
 0xbad   :  { %v1026_v55 = vmul.f32 %v1323_v42, %v1024_v54  ;;  %vm1031_vm8 = vweird.f32 %v1323_v42 }
 0xbae   :  { %vm1032_vm11 = vmor %vm1030_vm9, %vm1031_vm8 }
 0xbaf   :  { %v1027_v57 = vsub.f32 1.0, %v1026_v55 }
 0xbb1   :  { %v1028_v39 = vmul.f32 %v1323_v42, %v1027_v57 }
 0xbb3   :  { %v1029_v60 = vadd.f32 %v1323_v42, %v1028_v39 }
 0xbb5   :  { %v1033_v63 = vsel %vm1032_vm11, %v1323_v42, %v1029_v60 }
 0xbb6   :  { %v1038_v62 = vsel %vm1035_vm12, %v1037_v61, %v1033_v63 }
 0xbb7   :  { %v1040_v0 = vmul.f32 2.0, %v1038_v62 }
 0xbb9   :  { %v1233_v2 = vadd.f32 -1.0, %v1040_v0 }
 0xbbb   :  { %v1042_v3 = vsel %vm1746_vm10, %v1233_v2, %v1038_v62 }
 0xbbc   :  { %1045 = vrot.lane.b32.xlu2 %v1042_v3, %s1508_s26  ;;  %v1043_v32 = vmul.f32 %v1042_v3, %v898_v27 }
 0xbc4   :  { %1063 = vrot.lane.b32.xlu2 %v1061_v5, %s1516_s11 }
 0xbcc   :  { %913 = vrot.lane.b32.xlu2 %v911_v33, %s1515_s3 }
 0xc16   :  { %v1046_v6 = vpop.permute.xlu2 %1045 }
 0xc17   :  { %v1048_v1 = vmul.f32 %v1046_v6, %v1042_v3 }
 0xc19   :  { %1050 = vrot.lane.b32.xlu0 %v1048_v1, %s1515_s3 }
 0xc1e   :  { %v1064_v12 = vpop.permute.xlu2 %1063 }
 0xc21   :  { %604 = vrot.lane.b32.xlu0 %v1815_v4, %s1515_s3  ;;  %v1258_v4 = vld [vmem:[%s1948_s15 + $0x8] sm:$0xff]  ;;  %s1517_s15 = smov [#allocation15]  }
 0xc22   :  { %1107 = vmatpush.bf16.msra.mxu2 %v1258_v4 }
 0xc26   :  { %v914_v41 = vpop.permute.xlu2 %913  ;;  %1108 = vmatpush.bf16.msra.mxu2 %v1257_v53 }
 0xc27   :  { %917 = vst.msk [vmem:[#allocation3 + $0x10] sm:$0xff] %vm225_vm3, %v914_v41 }
 0xc2e   :  { %v1075_v56 = vld [vmem:[#allocation3 + $0x10] sm:$0xff] }
 0xc8b   :  { %v1051_v46 = vpop.permute.xlu0 %1050 }
 0xc8c   :  { %v1053_v7 = vadd.f32 %v1051_v46, %v1043_v32 }
 0xc8e   :  { %1324 = vtanh.f32 %v1053_v7 }
 0xc93   :  { %v605_v23 = vpop.permute.xlu0 %604 }
 0xc94   :  { %v1325_v15 = vpop.eup %1324  ;;  %607 = vst.msk [vmem:[#allocation3] sm:$0xff] %vm225_vm3, %v605_v23 }
 0xc95   :  { %1056 = vrot.lane.b32.xlu1 %v1325_v15, %s1508_s26  ;;  %s1128_s26 = sshll.u32 %s1517_s15, 4  ;;  %s1129_s26 = int_to_ptr.vmem [resolvable:$true] %s1128_s26 }
 0xc9b   :  { %v1073_v20 = vld [vmem:[#allocation3] sm:$0xff] }
 0xc9d   :  { %758 = vrot.lane.b32.xlu1 %v1863_v25, %s1515_s3 }
 0xd07   :  { %v1057_v16 = vpop.permute.xlu1 %1056 }
 0xd08   :  { %v1059_v17 = vmul.f32 %v1057_v16, %v1042_v3 }
 0xd0a   :  { %v1066_v18 = vmul.f32 %v1064_v12, %v1059_v17 }
 0xd0c   :  { %1068 = vrot.lane.b32.xlu0 %v1066_v18, %s1515_s3 }
 0xd0f   :  { %v759_v19 = vpop.permute.xlu1 %758 }
 0xd10   :  { %762 = vst.msk [vmem:[#allocation3 + $0x8] sm:$0xff] %vm225_vm3, %v759_v19 }
 0xd17   :  { %v1074_v25 = vld [vmem:[#allocation3 + $0x8] sm:$0xff] }
 0xd18   :  { %v1077_v22 = vpack.c.bf16 %v1074_v25, %v1073_v20 }
 0xd1a   :  { %1242 = vmatmul.msk.bf16.vlgmr.msra.gmra.mxu2 %vm225_vm3, %v1077_v22 }
 0xd7e   :  { %v1069_v24 = vpop.permute.xlu0 %1068 }
 0xd7f   :  { %1072 = vst.msk [vmem:[#allocation3 + $0x18] sm:$0xff] %vm225_vm3, %v1069_v24 }
 0xd86   :  { %v1076_v26 = vld [vmem:[#allocation3 + $0x18] sm:$0xff] }
 0xd87   :  { %v1078_v27 = vpack.c.bf16 %v1076_v26, %v1075_v56 }
 0xd89   :  { %1243 = vmatmul.msk.bf16.gmra.mxu2 %vm225_vm3, %v1078_v27 }
 0xd9d   :  { %v1110_v29 = vpop.f32.mrf.mxu2 }
 0xd9e   :  { %v1111_v30 = vadd.f32 %v1110_v29, %v395_v28 }
 0xda0   :  { %1120 = vst.msk [vmem:[#allocation15] sm:$0xff] %vm169_vm0, %v1111_v30 }
 0xda5   :  { %v1112_v40 = vpop.f32.mrf.mxu2 }
 0xda6   :  { %v1113_v33 = vadd.f32 %v1112_v40, %v397_v31 }
 0xda8   :  { %1121 = vst.msk [vmem:[#allocation15 + $0x8] sm:$0xff] %vm169_vm0, %v1113_v33 }
 0xe0c   :  { %v1115_v14 = vpop.f32.mrf.mxu2 }
 0xe0d   :  { %v1116_v34 = vadd.f32 %v1115_v14, %v1836_v10 }
 0xe0f   :  { %1122 = vst.msk [vmem:[#allocation15 + $0x10] sm:$0xff] %vm169_vm0, %v1116_v34 }
 0xe14   :  { %v1117_v35 = vpop.f32.mrf.mxu2 }
 0xe15   :  { %v1118_v8 = vadd.f32 %v1117_v35, %v402_v48 }
 0xe17   :  { %1123 = vst.msk [vmem:[#allocation15 + $0x18] sm:$0xff] %vm169_vm0, %v1118_v8 }
 0xe18   :  { %1136 = dma.vmem_to_hbm [thread:$0]  %s1129_s26, 512, %s1131_s8, [#allocation6], %s1505_s19, %s1505_s19, %s1506_s1  }
 0xe19   :  { %1502 = dma.done.wait [#allocation6], 512  }
 0xe1a   :  { %1503 = vsyncadd [#allocation6], 4294966784 }
 0xe1b   :  { %1141 = vsyncpa [#allocation5], 1 }
 0xe1c   :  { %1142 = vsyncpa [#allocation8], 1 }
 0xe1d   :  { %1143 = vsyncpa [#allocation11], 1 }
 0xe1e   :  { %1144 = vsyncpa [#allocation14], 1 }
 0xe1f   :  { %1145 = vsyncpa [#allocation6], 1 }

</bundles_post_ra>
